<compile_context>
chip_gen: v7x
topology: tpu7x:2x2x1
jax: 0.10.0
libtpu: 0.0.40
codegen_flags: <defaults>
</compile_context>

<pallas_src>
import jax
import jax.numpy as jnp
from jax import lax
from jax.experimental import pallas as pl
from jax.experimental.pallas import tpu as pltpu

# Packed accumulator / output lanes:
#   0..2: loss_nce_1/2/3 sums, 3: loss_vce sum, 4: loss_bbox_conf sum,
#   5: loss_bbox (per-sample means) sum, 6: #samples with >=1 box, 7: unused.
_N_SLOTS = 8


def _swig_loss_kernel(n1_ref, n2_ref, n3_ref, verb_ref,
                      labels_ref, conf_ref, pbox_ref, tbox_ref,
                      nroles_ref, gtverbs_ref, valid_ref,
                      out_ref, acc_ref):
    c = pl.program_id(0)          # core-parallel axis
    b = pl.program_id(1)          # batch-reduction axis (arbitrary)
    nb = pl.num_programs(1)
    TB, R, Cn = n1_ref.shape
    Cv = verb_ref.shape[-1]

    @pl.when(b == 0)
    def _init():
        acc_ref[...] = jnp.zeros_like(acc_ref)

    base = (c * nb + b) * TB
    if TB % 8 == 0:
        base = pl.multiple_of(base, 8)

    # Per-sample metadata for this tile, sliced from resident full-batch arrays.
    nr = nroles_ref[pl.ds(base, TB), :]                        # (TB, 1) int32
    nr_f = jnp.maximum(nr.astype(jnp.float32), 1.0)            # guard num_roles == 0
    gt = gtverbs_ref[pl.ds(base, TB), :]                       # (TB, 1) int32
    valid = valid_ref[pl.ds(base, TB), :]                      # (TB, 1) f32
    labels = labels_ref[pl.ds(base, TB), :, :]                 # (TB, R, 3) int32
    conf = conf_ref[pl.ds(base, TB), :]                        # (TB, R) f32
    pbox = pbox_ref[pl.ds(base, TB), :, :]                     # (TB, R, 4) f32
    tbox = tbox_ref[pl.ds(base, TB), :, :]                     # (TB, R, 4) f32

    vmask = valid > 0.0                                        # (TB, 1) bool
    role_mask = (lax.broadcasted_iota(jnp.int32, (TB, R), 1) < nr)   # (TB, R) bool

    # Shared across the 3 noun heads: label-smoothing weight tensor
    #   w[c] = 0.8 * (#annotators with label c)  +  0.6 / Cn
    # so that  sum_n LabelSmoothing(0.2) = 3*lse - sum_c x[c]*w[c].
    col = lax.broadcasted_iota(jnp.int32, (TB, R, Cn), 2)
    onehot3 = ((col == labels[:, :, 0:1]).astype(jnp.float32)
               + (col == labels[:, :, 1:2]).astype(jnp.float32)
               + (col == labels[:, :, 2:3]).astype(jnp.float32))
    w_noun = 0.8 * onehot3 + (0.6 / Cn)

    def noun_head_loss(x):
        m = jnp.max(x, axis=-1, keepdims=True)                 # (TB, R, 1)
        lse = m[:, :, 0] + jnp.log(jnp.sum(jnp.exp(x - m), axis=-1))   # (TB, R)
        wx = jnp.sum(x * w_noun, axis=-1)                      # (TB, R)
        per_role = 3.0 * lse - wx
        # select (not multiply) so NaN/inf from garbage tail rows cannot leak
        masked = jnp.where(role_mask, per_role, 0.0)
        return jnp.sum(masked, axis=-1, keepdims=True) / nr_f  # (TB, 1)

    l_n1 = noun_head_loss(n1_ref[...])
    l_n2 = noun_head_loss(n2_ref[...])
    l_n3 = noun_head_loss(n3_ref[...])

    # ---- verb LabelSmoothing(0.3), same fused-weight trick ----
    xv = verb_ref[...]                                          # (TB, Cv)
    mv = jnp.max(xv, axis=-1, keepdims=True)
    lse_v = mv + jnp.log(jnp.sum(jnp.exp(xv - mv), axis=-1, keepdims=True))
    colv = lax.broadcasted_iota(jnp.int32, (TB, Cv), 1)
    w_verb = 0.7 * (colv == gt).astype(jnp.float32) + (0.3 / Cv)
    l_v = lse_v - jnp.sum(xv * w_verb, axis=-1, keepdims=True)  # (TB, 1)

    # ---- bbox-existence BCE-with-logits, mean over the first num_roles slots ----
    exist_b = tbox[:, :, 0] != -1.0                             # (TB, R) bool
    exist_f = exist_b.astype(jnp.float32)
    bce = (jnp.maximum(conf, 0.0) - conf * exist_f
           + jnp.log(1.0 + jnp.exp(-jnp.abs(conf))))
    l_c = jnp.sum(jnp.where(role_mask, bce, 0.0),
                  axis=-1, keepdims=True) / nr_f                # (TB, 1)

    # ---- bbox L1 over existing boxes (per-sample mean over its boxes) ----
    diff = jnp.abs(pbox - tbox) * exist_f[:, :, None]           # (TB, R, 4)
    l1_sum = jnp.sum(jnp.sum(diff, axis=-1), axis=-1, keepdims=True)  # (TB, 1)
    num_box = jnp.sum(exist_f, axis=-1, keepdims=True)          # (TB, 1)
    has_box = (num_box > 0.0).astype(jnp.float32)
    l_l1 = has_box * l1_sum / jnp.maximum(num_box, 1.0)         # (TB, 1)

    # TODO(synk): GIoU loss requires box_ops.swig_box_cxcywh_to_xyxy /
    # generalized_box_iou which are not provided with the module.

    # ---- pack per-sample contributions into one (TB, 8) tile and accumulate ----
    lane = lax.broadcasted_iota(jnp.int32, (TB, _N_SLOTS), 1)
    contrib = (jnp.where(lane == 0, l_n1, 0.0)
               + jnp.where(lane == 1, l_n2, 0.0)
               + jnp.where(lane == 2, l_n3, 0.0)
               + jnp.where(lane == 3, l_v, 0.0)
               + jnp.where(lane == 4, l_c, 0.0)
               + jnp.where(lane == 5, l_l1, 0.0)
               + jnp.where(lane == 6, has_box, 0.0))
    contrib = jnp.where(vmask, contrib, 0.0)                    # kill padded rows (+NaN)
    acc_ref[...] += jnp.sum(contrib, axis=0, keepdims=True)     # (1, 8)

    @pl.when(b == nb - 1)
    def _finalize():
        out_ref[...] = acc_ref[...].reshape(1, 1, _N_SLOTS)


def _pad_batch(x, b_pad):
    pad = b_pad - x.shape[0]
    if pad == 0:
        return x
    return jnp.pad(x, [(0, pad)] + [(0, 0)] * (x.ndim - 1))


@jax.jit
def swig_criterion(pred_noun_1, pred_noun_2, pred_noun_3, labels, num_roles,
                   pred_verb, gt_verbs, pred_bbox, pred_bbox_conf, target_bboxes):
    B, R, Cn = pred_noun_1.shape
    Cv = pred_verb.shape[-1]

    TB = 8 if B >= 8 else B                  # samples per grid step
    num_blocks = -(-B // TB)                 # total batch tiles (last may be partial)
    # split over 2 TensorCores only when it divides evenly (no fully-OOB blocks)
    NC = 2 if (num_blocks >= 2 and num_blocks % 2 == 0) else 1
    bpc = num_blocks // NC                   # grid steps per core
    B_side = num_blocks * TB                 # padded size for SMALL side tensors only

    # Big tensors (noun heads, verb logits) are passed UNPADDED; only the cheap
    # side tensors are padded so in-kernel pl.ds slicing stays in bounds.
    valid = (jnp.arange(B_side) < B).astype(jnp.float32).reshape(B_side, 1)
    lab = _pad_batch(labels.astype(jnp.int32), B_side)
    conf = _pad_batch(pred_bbox_conf, B_side)
    pbox = _pad_batch(pred_bbox, B_side)
    tbox = _pad_batch(target_bboxes, B_side)
    nroles = _pad_batch(num_roles.astype(jnp.int32).reshape(B, 1), B_side)
    gtv = _pad_batch(gt_verbs.astype(jnp.int32).reshape(B, 1), B_side)

    blk3 = lambda c, b: (c * bpc + b, 0, 0)
    blk2 = lambda c, b: (c * bpc + b, 0)
    res3 = lambda c, b: (0, 0, 0)
    res2 = lambda c, b: (0, 0)

    in_specs = [
        pl.BlockSpec((TB, R, Cn), blk3),        # pred_noun_1 (pipelined)
        pl.BlockSpec((TB, R, Cn), blk3),        # pred_noun_2 (pipelined)
        pl.BlockSpec((TB, R, Cn), blk3),        # pred_noun_3 (pipelined)
        pl.BlockSpec((TB, Cv), blk2),           # pred_verb   (pipelined)
        pl.BlockSpec((B_side, R, 3), res3),     # labels        (resident, DMA once)
        pl.BlockSpec((B_side, R), res2),        # bbox conf     (resident)
        pl.BlockSpec((B_side, R, 4), res3),     # pred bboxes   (resident)
        pl.BlockSpec((B_side, R, 4), res3),     # target bboxes (resident)
        pl.BlockSpec((B_side, 1), res2),        # num_roles     (resident)
        pl.BlockSpec((B_side, 1), res2),        # gt_verbs      (resident)
        pl.BlockSpec((B_side, 1), res2),        # valid mask    (resident)
    ]
    out_specs = pl.BlockSpec((1, 1, _N_SLOTS), lambda c, b: (c, 0, 0))

    # VMEM budget: double-buffered noun/verb blocks + resident side tensors +
    # in-kernel temporaries; clipped so tuning on v6e stays legal on v7x (64 MiB).
    block_bytes = 4 * TB * (3 * R * Cn + Cv) * 2
    temp_bytes = 4 * TB * R * Cn * 4
    resident_bytes = 4 * B_side * (12 * R + 3)
    vmem_limit = int(min(max(block_bytes + temp_bytes + resident_bytes + (2 << 20),
                             32 << 20), 56 << 20))

    out = pl.pallas_call(
        _swig_loss_kernel,
        out_shape=jax.ShapeDtypeStruct((NC, 1, _N_SLOTS), jnp.float32),
        grid_spec=pltpu.PrefetchScalarGridSpec(
            num_scalar_prefetch=0,
            grid=(NC, bpc),
            in_specs=in_specs,
            out_specs=out_specs,
            scratch_shapes=[pltpu.VMEM((1, _N_SLOTS), jnp.float32)],
        ),
        compiler_params=pltpu.CompilerParams(
            dimension_semantics=("parallel", "arbitrary"),
            vmem_limit_bytes=vmem_limit),
    )(pred_noun_1, pred_noun_2, pred_noun_3, pred_verb,
      lab, conf, pbox, tbox, nroles, gtv, valid)

    totals = jnp.sum(out, axis=(0, 1))         # (8,) combine per-core partials
    inv_b = 1.0 / B
    cnt = totals[6]
    loss_bbox = jnp.where(cnt > 0.0, totals[5] / jnp.maximum(cnt, 1.0), 0.0)

    # --- glue: verb top-k accuracy (lax.top_k instead of a full argsort) ---
    _, top5_idx = lax.top_k(pred_verb, 5)
    match = top5_idx == gt_verbs[:, None]
    top1 = jnp.mean(match[:, 0].astype(jnp.float32)) * 100.0
    top5 = jnp.mean(jnp.any(match, axis=-1).astype(jnp.float32)) * 100.0

    return {
        'loss_vce': totals[3] * inv_b,
        'loss_nce_1': totals[0] * inv_b,
        'loss_nce_2': totals[1] * inv_b,
        'loss_nce_3': totals[2] * inv_b,
        'loss_bbox': loss_bbox,
        'loss_giou': jnp.float32(0.0),   # TODO(synk): needs box_ops (not provided)
        'loss_bbox_conf': totals[4] * inv_b,
        'verb_acc_top1': top1,
        'verb_acc_top5': top5,
        # TODO(synk): noun_acc_* / bbox_acc_* metrics need accuracy_swig /
        # accuracy_swig_bbox and SWiG JSON metadata, which are not provided.
    }


def _reference(pn1, pn2, pn3, labels, num_roles, pv, gtv, pbx, pbc, tbx):
    import numpy as np

    def logsoftmax(x):
        m = x.max(-1, keepdims=True)
        return x - (np.log(np.exp(x - m).sum(-1, keepdims=True)) + m)

    def label_smoothing(logits, target, smoothing):
        lp = logsoftmax(logits)
        nll = -lp[np.arange(target.shape[0]), target]
        smooth = -lp.mean(-1)
        return ((1 - smoothing) * nll + smoothing * smooth).mean()

    pn = [np.asarray(pn1, np.float64), np.asarray(pn2, np.float64),
          np.asarray(pn3, np.float64)]
    labels = np.asarray(labels); num_roles = np.asarray(num_roles)
    pv = np.asarray(pv, np.float64); gtv = np.asarray(gtv)
    pbx = np.asarray(pbx, np.float64); pbc = np.asarray(pbc, np.float64)
    tbx = np.asarray(tbx, np.float64)
    B = pn[0].shape[0]

    noun_losses = [[], [], []]
    conf_losses, l1_losses = [], []
    for i in range(B):
        nr = int(num_roles[i])
        for k in range(3):
            s = 0.0
            for n in range(3):
                s += label_smoothing(pn[k][i, :nr], labels[i, :nr, n], 0.2)
            noun_losses[k].append(s)
        exist = tbx[i, :, 0] != -1
        y = exist.astype(np.float64)
        x = pbc[i]
        bce = np.maximum(x, 0) - x * y + np.log1p(np.exp(-np.abs(x)))
        conf_losses.append(bce[:nr].mean())
        nb = int(exist.sum())
        if nb > 0:
            l1_losses.append(np.abs(pbx[i][exist] - tbx[i][exist]).sum() / nb)

    out = {
        'loss_nce_1': float(np.mean(noun_losses[0])),
        'loss_nce_2': float(np.mean(noun_losses[1])),
        'loss_nce_3': float(np.mean(noun_losses[2])),
        'loss_vce': float(label_smoothing(pv, gtv, 0.3)),
        'loss_bbox_conf': float(np.mean(conf_losses)),
        'loss_bbox': float(np.mean(l1_losses)) if l1_losses else 0.0,
    }
    order = np.argsort(-pv, axis=-1)
    out['verb_acc_top1'] = float((order[:, :1] == gtv[:, None]).any(-1).mean() * 100.0)
    out['verb_acc_top5'] = float((order[:, :5] == gtv[:, None]).any(-1).mean() * 100.0)
    return out


if __name__ == "__main__":
    key = jax.random.PRNGKey(0)
    B, R, Cn, Cv = 20, 8, 128, 128          # small test shapes (non-multiple batch
    ks = jax.random.split(key, 10)          # exercises the partial tail block path)

    pred_noun_1 = jax.random.normal(ks[0], (B, R, Cn), jnp.float32)
    pred_noun_2 = jax.random.normal(ks[1], (B, R, Cn), jnp.float32)
    pred_noun_3 = jax.random.normal(ks[2], (B, R, Cn), jnp.float32)
    pred_verb = jax.random.normal(ks[3], (B, Cv), jnp.float32)
    pred_bbox = jax.random.uniform(ks[4], (B, R, 4), jnp.float32)
    pred_bbox_conf = jax.random.normal(ks[5], (B, R), jnp.float32)
    labels = jax.random.randint(ks[6], (B, R, 3), 0, Cn, jnp.int32)
    gt_verbs = jax.random.randint(ks[7], (B,), 0, Cv, jnp.int32)
    num_roles = jax.random.randint(ks[8], (B,), 1, R + 1, jnp.int32)

    num_boxes = jax.random.randint(ks[9], (B,), 0, R + 1, jnp.int32)
    num_boxes = num_boxes.at[0].set(0)      # guarantee a "no boxes" sample
    exist = jnp.arange(R)[None, :] < num_boxes[:, None]
    raw_boxes = jax.random.uniform(jax.random.PRNGKey(42), (B, R, 4), jnp.float32)
    target_bboxes = jnp.where(exist[:, :, None], raw_boxes, -1.0)

    out = swig_criterion(pred_noun_1, pred_noun_2, pred_noun_3, labels, num_roles,
                         pred_verb, gt_verbs, pred_bbox, pred_bbox_conf,
                         target_bboxes)
    out = jax.block_until_ready(out)

    ref = _reference(pred_noun_1, pred_noun_2, pred_noun_3, labels, num_roles,
                     pred_verb, gt_verbs, pred_bbox, pred_bbox_conf, target_bboxes)
    for k, v in ref.items():
        got = float(out[k])
        assert abs(got - v) < 1e-3 * max(1.0, abs(v)), (k, got, v)

    print("KERNEL_OK")
</pallas_src>

<mosaic_0001>
module attributes {stable_mosaic.version = 11 : i64} {
  func.func @_swig_loss_kernel(%arg0: i32, %arg1: i32, %arg2: memref<8x8x128xf32, #tpu.memory_space<vmem>>, %arg3: memref<8x8x128xf32, #tpu.memory_space<vmem>>, %arg4: memref<8x8x128xf32, #tpu.memory_space<vmem>>, %arg5: memref<8x128xf32, #tpu.memory_space<vmem>>, %arg6: memref<24x8x3xi32, #tpu.memory_space<vmem>>, %arg7: memref<24x8xf32, #tpu.memory_space<vmem>>, %arg8: memref<24x8x4xf32, #tpu.memory_space<vmem>>, %arg9: memref<24x8x4xf32, #tpu.memory_space<vmem>>, %arg10: memref<24x1xi32, #tpu.memory_space<vmem>>, %arg11: memref<24x1xi32, #tpu.memory_space<vmem>>, %arg12: memref<24x1xf32, #tpu.memory_space<vmem>>, %arg13: memref<1x1x8xf32, #tpu.memory_space<vmem>>, %arg14: memref<1x8xf32, #tpu.memory_space<vmem>>) attributes {dimension_semantics = [#tpu.dimension_semantics<parallel>, #tpu.dimension_semantics<arbitrary>], iteration_bounds = array<i64: 1, 3>, scalar_prefetch = 0 : i64, scratch_operands = 1 : i64, tpu.core_type = #tpu.core_type<tc>, window_params = [{transform_indices = @transform_0, window_bounds = array<i64: 8, 8, 128>}, {transform_indices = @transform_1, window_bounds = array<i64: 8, 8, 128>}, {transform_indices = @transform_2, window_bounds = array<i64: 8, 8, 128>}, {transform_indices = @transform_3, window_bounds = array<i64: 8, 128>}, {pipeline_mode = #tpu.pipeline_mode<synchronous>, transform_indices = @transform_4, window_bounds = array<i64: 24, 8, 3>}, {pipeline_mode = #tpu.pipeline_mode<synchronous>, transform_indices = @transform_5, window_bounds = array<i64: 24, 8>}, {pipeline_mode = #tpu.pipeline_mode<synchronous>, transform_indices = @transform_6, window_bounds = array<i64: 24, 8, 4>}, {pipeline_mode = #tpu.pipeline_mode<synchronous>, transform_indices = @transform_7, window_bounds = array<i64: 24, 8, 4>}, {pipeline_mode = #tpu.pipeline_mode<synchronous>, transform_indices = @transform_8, window_bounds = array<i64: 24, 1>}, {pipeline_mode = #tpu.pipeline_mode<synchronous>, transform_indices = @transform_9, window_bounds = array<i64: 24, 1>}, {pipeline_mode = #tpu.pipeline_mode<synchronous>, transform_indices = @transform_10, window_bounds = array<i64: 24, 1>}, {transform_indices = @transform_11, window_bounds = array<i64: 1, 1, 8>}]} {
    %c0_i32 = arith.constant 0 : i32
    %0 = arith.cmpi eq, %arg1, %c0_i32 : i32
    %1 = arith.extui %0 : i1 to i32
    %c0_i32_0 = arith.constant 0 : i32
    %2 = arith.cmpi ne, %1, %c0_i32_0 : i32
    scf.if %2 {
      %cst_75 = arith.constant 0.000000e+00 : f32
      %236 = vector.broadcast %cst_75 : f32 to vector<1x8xf32>
      %c0_76 = arith.constant 0 : index
      %c0_77 = arith.constant 0 : index
      %237 = vector.load %arg14[%c0_76, %c0_77] : memref<1x8xf32, #tpu.memory_space<vmem>>, vector<1x8xf32>
      tpu.vector_store %arg14[%c0_76, %c0_77], %236 {strides = array<i32>} : memref<1x8xf32, #tpu.memory_space<vmem>>, vector<1x8xf32>,
    } else {
    }
    %c3_i32 = arith.constant 3 : i32
    %3 = arith.muli %arg0, %c3_i32 : i32
    %4 = arith.addi %3, %arg1 : i32
    %c8_i32 = arith.constant 8 : i32
    %5 = arith.muli %4, %c8_i32 : i32
    %6 = tpu.assume_multiple %5, 8 : i32
    %7 = arith.index_cast %6 : i32 to index
    %c0 = arith.constant 0 : index
    %8 = vector.load %arg10[%7, %c0] : memref<24x1xi32, #tpu.memory_space<vmem>>, vector<8x1xi32>
    %9 = arith.sitofp %8 : vector<8x1xi32> to vector<8x1xf32>
    %cst = arith.constant 1.000000e+00 : f32
    %10 = vector.broadcast %cst : f32 to vector<8x1xf32>
    %11 = arith.maximumf %9, %10 : vector<8x1xf32>
    %12 = arith.index_cast %6 : i32 to index
    %c0_1 = arith.constant 0 : index
    %13 = vector.load %arg11[%12, %c0_1] : memref<24x1xi32, #tpu.memory_space<vmem>>, vector<8x1xi32>
    %14 = arith.index_cast %6 : i32 to index
    %c0_2 = arith.constant 0 : index
    %15 = vector.load %arg12[%14, %c0_2] : memref<24x1xf32, #tpu.memory_space<vmem>>, vector<8x1xf32>
    %16 = arith.index_cast %6 : i32 to index
    %c0_3 = arith.constant 0 : index
    %c0_4 = arith.constant 0 : index
    %17 = vector.load %arg6[%16, %c0_3, %c0_4] : memref<24x8x3xi32, #tpu.memory_space<vmem>>, vector<8x8x3xi32>
    %18 = arith.index_cast %6 : i32 to index
    %c0_5 = arith.constant 0 : index
    %19 = vector.load %arg7[%18, %c0_5] : memref<24x8xf32, #tpu.memory_space<vmem>>, vector<8x8xf32>
    %20 = arith.index_cast %6 : i32 to index
    %c0_6 = arith.constant 0 : index
    %c0_7 = arith.constant 0 : index
    %21 = vector.load %arg8[%20, %c0_6, %c0_7] : memref<24x8x4xf32, #tpu.memory_space<vmem>>, vector<8x8x4xf32>
    %22 = arith.index_cast %6 : i32 to index
    %c0_8 = arith.constant 0 : index
    %c0_9 = arith.constant 0 : index
    %23 = vector.load %arg9[%22, %c0_8, %c0_9] : memref<24x8x4xf32, #tpu.memory_space<vmem>>, vector<8x8x4xf32>
    %cst_10 = arith.constant 0.000000e+00 : f32
    %24 = vector.broadcast %cst_10 : f32 to vector<8x1xf32>
    %25 = arith.cmpf ogt, %15, %24 : vector<8x1xf32>
    %26 = tpu.iota {dimensions = array<i32: 1>} : vector<8x8xi32>
    %27 = vector.broadcast %8 : vector<8x1xi32> to vector<8x8xi32>
    %28 = arith.cmpi slt, %26, %27 : vector<8x8xi32>
    %29 = tpu.iota {dimensions = array<i32: 2>} : vector<8x8x128xi32>
    %30 = vector.extract_strided_slice %17 {offsets = [0, 0, 0], sizes = [8, 8, 1], strides = [1, 1, 1]} : vector<8x8x3xi32> to vector<8x8x1xi32>
    %31 = vector.broadcast %30 : vector<8x8x1xi32> to vector<8x8x128xi32>
    %32 = arith.cmpi eq, %29, %31 : vector<8x8x128xi32>
    %33 = arith.extui %32 : vector<8x8x128xi1> to vector<8x8x128xi32>
    %34 = arith.sitofp %33 : vector<8x8x128xi32> to vector<8x8x128xf32>
    %35 = vector.extract_strided_slice %17 {offsets = [0, 0, 1], sizes = [8, 8, 1], strides = [1, 1, 1]} : vector<8x8x3xi32> to vector<8x8x1xi32>
    %36 = vector.broadcast %35 : vector<8x8x1xi32> to vector<8x8x128xi32>
    %37 = arith.cmpi eq, %29, %36 : vector<8x8x128xi32>
    %38 = arith.extui %37 : vector<8x8x128xi1> to vector<8x8x128xi32>
    %39 = arith.sitofp %38 : vector<8x8x128xi32> to vector<8x8x128xf32>
    %40 = arith.addf %34, %39 : vector<8x8x128xf32>
    %41 = vector.extract_strided_slice %17 {offsets = [0, 0, 2], sizes = [8, 8, 1], strides = [1, 1, 1]} : vector<8x8x3xi32> to vector<8x8x1xi32>
    %42 = vector.broadcast %41 : vector<8x8x1xi32> to vector<8x8x128xi32>
    %43 = arith.cmpi eq, %29, %42 : vector<8x8x128xi32>
    %44 = arith.extui %43 : vector<8x8x128xi1> to vector<8x8x128xi32>
    %45 = arith.sitofp %44 : vector<8x8x128xi32> to vector<8x8x128xf32>
    %46 = arith.addf %40, %45 : vector<8x8x128xf32>
    %cst_11 = arith.constant 8.000000e-01 : f32
    %47 = vector.broadcast %cst_11 : f32 to vector<8x8x128xf32>
    %48 = arith.mulf %47, %46 : vector<8x8x128xf32>
    %cst_12 = arith.constant 4.687500e-03 : f32
    %49 = vector.broadcast %cst_12 : f32 to vector<8x8x128xf32>
    %50 = arith.addf %48, %49 : vector<8x8x128xf32>
    %c0_13 = arith.constant 0 : index
    %c0_14 = arith.constant 0 : index
    %c0_15 = arith.constant 0 : index
    %51 = vector.load %arg2[%c0_13, %c0_14, %c0_15] : memref<8x8x128xf32, #tpu.memory_space<vmem>>, vector<8x8x128xf32>
    %cst_16 = arith.constant dense<0xFF800000> : vector<8x8xf32>
    %52 = vector.multi_reduction <maximumf>, %51, %cst_16 [2] : vector<8x8x128xf32> to vector<8x8xf32>
    %53 = vector.shape_cast %52 : vector<8x8xf32> to vector<8x8x1xf32>
    %54 = vector.shape_cast %53 : vector<8x8x1xf32> to vector<8x8xf32>
    %55 = vector.broadcast %53 : vector<8x8x1xf32> to vector<8x8x128xf32>
    %56 = arith.subf %51, %55 : vector<8x8x128xf32>
    %57 = math.exp %56 : vector<8x8x128xf32>
    %cst_17 = arith.constant dense<0.000000e+00> : vector<8x8xf32>
    %58 = vector.multi_reduction <add>, %57, %cst_17 [2] : vector<8x8x128xf32> to vector<8x8xf32>
    %59 = math.log %58 : vector<8x8xf32>
    %60 = arith.addf %54, %59 : vector<8x8xf32>
    %61 = arith.mulf %51, %50 : vector<8x8x128xf32>
    %cst_18 = arith.constant dense<0.000000e+00> : vector<8x8xf32>
    %62 = vector.multi_reduction <add>, %61, %cst_18 [2] : vector<8x8x128xf32> to vector<8x8xf32>
    %cst_19 = arith.constant 3.000000e+00 : f32
    %63 = vector.broadcast %cst_19 : f32 to vector<8x8xf32>
    %64 = arith.mulf %63, %60 : vector<8x8xf32>
    %65 = arith.subf %64, %62 : vector<8x8xf32>
    %cst_20 = arith.constant 0.000000e+00 : f32
    %66 = vector.broadcast %cst_20 : f32 to vector<8x8xf32>
    %67 = arith.select %28, %65, %66 : vector<8x8xi1>, vector<8x8xf32>
    %cst_21 = arith.constant dense<0.000000e+00> : vector<8xf32>
    %68 = vector.multi_reduction <add>, %67, %cst_21 [1] : vector<8x8xf32> to vector<8xf32>
    %69 = vector.shape_cast %68 : vector<8xf32> to vector<8x1xf32>
    %70 = arith.divf %69, %11 : vector<8x1xf32>
    %c0_22 = arith.constant 0 : index
    %c0_23 = arith.constant 0 : index
    %c0_24 = arith.constant 0 : index
    %71 = vector.load %arg3[%c0_22, %c0_23, %c0_24] : memref<8x8x128xf32, #tpu.memory_space<vmem>>, vector<8x8x128xf32>
    %cst_25 = arith.constant dense<0xFF800000> : vector<8x8xf32>
    %72 = vector.multi_reduction <maximumf>, %71, %cst_25 [2] : vector<8x8x128xf32> to vector<8x8xf32>
    %73 = vector.shape_cast %72 : vector<8x8xf32> to vector<8x8x1xf32>
    %74 = vector.shape_cast %73 : vector<8x8x1xf32> to vector<8x8xf32>
    %75 = vector.broadcast %73 : vector<8x8x1xf32> to vector<8x8x128xf32>
    %76 = arith.subf %71, %75 : vector<8x8x128xf32>
    %77 = math.exp %76 : vector<8x8x128xf32>
    %cst_26 = arith.constant dense<0.000000e+00> : vector<8x8xf32>
    %78 = vector.multi_reduction <add>, %77, %cst_26 [2] : vector<8x8x128xf32> to vector<8x8xf32>
    %79 = math.log %78 : vector<8x8xf32>
    %80 = arith.addf %74, %79 : vector<8x8xf32>
    %81 = arith.mulf %71, %50 : vector<8x8x128xf32>
    %cst_27 = arith.constant dense<0.000000e+00> : vector<8x8xf32>
    %82 = vector.multi_reduction <add>, %81, %cst_27 [2] : vector<8x8x128xf32> to vector<8x8xf32>
    %cst_28 = arith.constant 3.000000e+00 : f32
    %83 = vector.broadcast %cst_28 : f32 to vector<8x8xf32>
    %84 = arith.mulf %83, %80 : vector<8x8xf32>
    %85 = arith.subf %84, %82 : vector<8x8xf32>
    %cst_29 = arith.constant 0.000000e+00 : f32
    %86 = vector.broadcast %cst_29 : f32 to vector<8x8xf32>
    %87 = arith.select %28, %85, %86 : vector<8x8xi1>, vector<8x8xf32>
    %cst_30 = arith.constant dense<0.000000e+00> : vector<8xf32>
    %88 = vector.multi_reduction <add>, %87, %cst_30 [1] : vector<8x8xf32> to vector<8xf32>
    %89 = vector.shape_cast %88 : vector<8xf32> to vector<8x1xf32>
    %90 = arith.divf %89, %11 : vector<8x1xf32>
    %c0_31 = arith.constant 0 : index
    %c0_32 = arith.constant 0 : index
    %c0_33 = arith.constant 0 : index
    %91 = vector.load %arg4[%c0_31, %c0_32, %c0_33] : memref<8x8x128xf32, #tpu.memory_space<vmem>>, vector<8x8x128xf32>
    %cst_34 = arith.constant dense<0xFF800000> : vector<8x8xf32>
    %92 = vector.multi_reduction <maximumf>, %91, %cst_34 [2] : vector<8x8x128xf32> to vector<8x8xf32>
    %93 = vector.shape_cast %92 : vector<8x8xf32> to vector<8x8x1xf32>
    %94 = vector.shape_cast %93 : vector<8x8x1xf32> to vector<8x8xf32>
    %95 = vector.broadcast %93 : vector<8x8x1xf32> to vector<8x8x128xf32>
    %96 = arith.subf %91, %95 : vector<8x8x128xf32>
    %97 = math.exp %96 : vector<8x8x128xf32>
    %cst_35 = arith.constant dense<0.000000e+00> : vector<8x8xf32>
    %98 = vector.multi_reduction <add>, %97, %cst_35 [2] : vector<8x8x128xf32> to vector<8x8xf32>
    %99 = math.log %98 : vector<8x8xf32>
    %100 = arith.addf %94, %99 : vector<8x8xf32>
    %101 = arith.mulf %91, %50 : vector<8x8x128xf32>
    %cst_36 = arith.constant dense<0.000000e+00> : vector<8x8xf32>
    %102 = vector.multi_reduction <add>, %101, %cst_36 [2] : vector<8x8x128xf32> to vector<8x8xf32>
    %cst_37 = arith.constant 3.000000e+00 : f32
    %103 = vector.broadcast %cst_37 : f32 to vector<8x8xf32>
    %104 = arith.mulf %103, %100 : vector<8x8xf32>
    %105 = arith.subf %104, %102 : vector<8x8xf32>
    %cst_38 = arith.constant 0.000000e+00 : f32
    %106 = vector.broadcast %cst_38 : f32 to vector<8x8xf32>
    %107 = arith.select %28, %105, %106 : vector<8x8xi1>, vector<8x8xf32>
    %cst_39 = arith.constant dense<0.000000e+00> : vector<8xf32>
    %108 = vector.multi_reduction <add>, %107, %cst_39 [1] : vector<8x8xf32> to vector<8xf32>
    %109 = vector.shape_cast %108 : vector<8xf32> to vector<8x1xf32>
    %110 = arith.divf %109, %11 : vector<8x1xf32>
    %c0_40 = arith.constant 0 : index
    %c0_41 = arith.constant 0 : index
    %111 = vector.load %arg5[%c0_40, %c0_41] : memref<8x128xf32, #tpu.memory_space<vmem>>, vector<8x128xf32>
    %cst_42 = arith.constant dense<0xFF800000> : vector<8xf32>
    %112 = vector.multi_reduction <maximumf>, %111, %cst_42 [1] : vector<8x128xf32> to vector<8xf32>
    %113 = vector.shape_cast %112 : vector<8xf32> to vector<8x1xf32>
    %114 = vector.broadcast %113 : vector<8x1xf32> to vector<8x128xf32>
    %115 = arith.subf %111, %114 : vector<8x128xf32>
    %116 = math.exp %115 : vector<8x128xf32>
    %cst_43 = arith.constant dense<0.000000e+00> : vector<8xf32>
    %117 = vector.multi_reduction <add>, %116, %cst_43 [1] : vector<8x128xf32> to vector<8xf32>
    %118 = vector.shape_cast %117 : vector<8xf32> to vector<8x1xf32>
    %119 = math.log %118 : vector<8x1xf32>
    %120 = arith.addf %113, %119 : vector<8x1xf32>
    %121 = tpu.iota {dimensions = array<i32: 1>} : vector<8x128xi32>
    %122 = vector.broadcast %13 : vector<8x1xi32> to vector<8x128xi32>
    %123 = arith.cmpi eq, %121, %122 : vector<8x128xi32>
    %124 = arith.extui %123 : vector<8x128xi1> to vector<8x128xi32>
    %125 = arith.sitofp %124 : vector<8x128xi32> to vector<8x128xf32>
    %cst_44 = arith.constant 0.699999988 : f32
    %126 = vector.broadcast %cst_44 : f32 to vector<8x128xf32>
    %127 = arith.mulf %126, %125 : vector<8x128xf32>
    %cst_45 = arith.constant 2.343750e-03 : f32
    %128 = vector.broadcast %cst_45 : f32 to vector<8x128xf32>
    %129 = arith.addf %127, %128 : vector<8x128xf32>
    %130 = arith.mulf %111, %129 : vector<8x128xf32>
    %cst_46 = arith.constant dense<0.000000e+00> : vector<8xf32>
    %131 = vector.multi_reduction <add>, %130, %cst_46 [1] : vector<8x128xf32> to vector<8xf32>
    %132 = vector.shape_cast %131 : vector<8xf32> to vector<8x1xf32>
    %133 = arith.subf %120, %132 : vector<8x1xf32>
    %134 = vector.extract_strided_slice %23 {offsets = [0, 0, 0], sizes = [8, 8, 1], strides = [1, 1, 1]} : vector<8x8x4xf32> to vector<8x8x1xf32>
    %135 = vector.shape_cast %134 : vector<8x8x1xf32> to vector<8x8xf32>
    %cst_47 = arith.constant -1.000000e+00 : f32
    %136 = vector.broadcast %cst_47 : f32 to vector<8x8xf32>
    %137 = arith.cmpf one, %135, %136 : vector<8x8xf32>
    %138 = arith.extui %137 : vector<8x8xi1> to vector<8x8xi32>
    %139 = arith.sitofp %138 : vector<8x8xi32> to vector<8x8xf32>
    %cst_48 = arith.constant 0.000000e+00 : f32
    %140 = vector.broadcast %cst_48 : f32 to vector<8x8xf32>
    %141 = arith.maximumf %19, %140 : vector<8x8xf32>
    %142 = arith.mulf %19, %139 : vector<8x8xf32>
    %143 = arith.subf %141, %142 : vector<8x8xf32>
    %144 = math.absf %19 : vector<8x8xf32>
    %cst_49 = arith.constant 0.000000e+00 : f32
    %145 = vector.broadcast %cst_49 : f32 to vector<8x8xf32>
    %146 = arith.subf %145, %144 : vector<8x8xf32>
    %147 = math.exp %146 : vector<8x8xf32>
    %cst_50 = arith.constant 1.000000e+00 : f32
    %148 = vector.broadcast %cst_50 : f32 to vector<8x8xf32>
    %149 = arith.addf %148, %147 : vector<8x8xf32>
    %150 = math.log %149 : vector<8x8xf32>
    %151 = arith.addf %143, %150 : vector<8x8xf32>
    %cst_51 = arith.constant 0.000000e+00 : f32
    %152 = vector.broadcast %cst_51 : f32 to vector<8x8xf32>
    %153 = arith.select %28, %151, %152 : vector<8x8xi1>, vector<8x8xf32>
    %cst_52 = arith.constant dense<0.000000e+00> : vector<8xf32>
    %154 = vector.multi_reduction <add>, %153, %cst_52 [1] : vector<8x8xf32> to vector<8xf32>
    %155 = vector.shape_cast %154 : vector<8xf32> to vector<8x1xf32>
    %156 = arith.divf %155, %11 : vector<8x1xf32>
    %157 = arith.subf %21, %23 : vector<8x8x4xf32>
    %158 = math.absf %157 : vector<8x8x4xf32>
    %159 = vector.shape_cast %139 : vector<8x8xf32> to vector<8x8x1xf32>
    %160 = vector.broadcast %159 : vector<8x8x1xf32> to vector<8x8x4xf32>
    %161 = arith.mulf %158, %160 : vector<8x8x4xf32>
    %cst_53 = arith.constant dense<0.000000e+00> : vector<8x8xf32>
    %162 = vector.multi_reduction <add>, %161, %cst_53 [2] : vector<8x8x4xf32> to vector<8x8xf32>
    %cst_54 = arith.constant dense<0.000000e+00> : vector<8xf32>
    %163 = vector.multi_reduction <add>, %162, %cst_54 [1] : vector<8x8xf32> to vector<8xf32>
    %164 = vector.shape_cast %163 : vector<8xf32> to vector<8x1xf32>
    %cst_55 = arith.constant dense<0.000000e+00> : vector<8xf32>
    %165 = vector.multi_reduction <add>, %139, %cst_55 [1] : vector<8x8xf32> to vector<8xf32>
    %166 = vector.shape_cast %165 : vector<8xf32> to vector<8x1xf32>
    %cst_56 = arith.constant 0.000000e+00 : f32
    %167 = vector.broadcast %cst_56 : f32 to vector<8x1xf32>
    %168 = arith.cmpf ogt, %166, %167 : vector<8x1xf32>
    %169 = arith.extui %168 : vector<8x1xi1> to vector<8x1xi32>
    %170 = arith.sitofp %169 : vector<8x1xi32> to vector<8x1xf32>
    %171 = arith.mulf %170, %164 : vector<8x1xf32>
    %cst_57 = arith.constant 1.000000e+00 : f32
    %172 = vector.broadcast %cst_57 : f32 to vector<8x1xf32>
    %173 = arith.maximumf %166, %172 : vector<8x1xf32>
    %174 = arith.divf %171, %173 : vector<8x1xf32>
    %175 = tpu.iota {dimensions = array<i32: 1>} : vector<8x8xi32>
    %c0_i32_58 = arith.constant 0 : i32
    %176 = vector.broadcast %c0_i32_58 : i32 to vector<8x8xi32>
    %177 = arith.cmpi eq, %175, %176 : vector<8x8xi32>
    %cst_59 = arith.constant 0.000000e+00 : f32
    %178 = vector.shape_cast %70 : vector<8x1xf32> to vector<8x1xf32>
    %179 = vector.broadcast %178 : vector<8x1xf32> to vector<8x8xf32>
    %180 = vector.broadcast %cst_59 : f32 to vector<8x8xf32>
    %181 = arith.select %177, %179, %180 : vector<8x8xi1>, vector<8x8xf32>
    %c1_i32 = arith.constant 1 : i32
    %182 = vector.broadcast %c1_i32 : i32 to vector<8x8xi32>
    %183 = arith.cmpi eq, %175, %182 : vector<8x8xi32>
    %cst_60 = arith.constant 0.000000e+00 : f32
    %184 = vector.shape_cast %90 : vector<8x1xf32> to vector<8x1xf32>
    %185 = vector.broadcast %184 : vector<8x1xf32> to vector<8x8xf32>
    %186 = vector.broadcast %cst_60 : f32 to vector<8x8xf32>
    %187 = arith.select %183, %185, %186 : vector<8x8xi1>, vector<8x8xf32>
    %188 = arith.addf %181, %187 : vector<8x8xf32>
    %c2_i32 = arith.constant 2 : i32
    %189 = vector.broadcast %c2_i32 : i32 to vector<8x8xi32>
    %190 = arith.cmpi eq, %175, %189 : vector<8x8xi32>
    %cst_61 = arith.constant 0.000000e+00 : f32
    %191 = vector.shape_cast %110 : vector<8x1xf32> to vector<8x1xf32>
    %192 = vector.broadcast %191 : vector<8x1xf32> to vector<8x8xf32>
    %193 = vector.broadcast %cst_61 : f32 to vector<8x8xf32>
    %194 = arith.select %190, %192, %193 : vector<8x8xi1>, vector<8x8xf32>
    %195 = arith.addf %188, %194 : vector<8x8xf32>
    %c3_i32_62 = arith.constant 3 : i32
    %196 = vector.broadcast %c3_i32_62 : i32 to vector<8x8xi32>
    %197 = arith.cmpi eq, %175, %196 : vector<8x8xi32>
    %cst_63 = arith.constant 0.000000e+00 : f32
    %198 = vector.shape_cast %133 : vector<8x1xf32> to vector<8x1xf32>
    %199 = vector.broadcast %198 : vector<8x1xf32> to vector<8x8xf32>
    %200 = vector.broadcast %cst_63 : f32 to vector<8x8xf32>
    %201 = arith.select %197, %199, %200 : vector<8x8xi1>, vector<8x8xf32>
    %202 = arith.addf %195, %201 : vector<8x8xf32>
    %c4_i32 = arith.constant 4 : i32
    %203 = vector.broadcast %c4_i32 : i32 to vector<8x8xi32>
    %204 = arith.cmpi eq, %175, %203 : vector<8x8xi32>
    %cst_64 = arith.constant 0.000000e+00 : f32
    %205 = vector.shape_cast %156 : vector<8x1xf32> to vector<8x1xf32>
    %206 = vector.broadcast %205 : vector<8x1xf32> to vector<8x8xf32>
    %207 = vector.broadcast %cst_64 : f32 to vector<8x8xf32>
    %208 = arith.select %204, %206, %207 : vector<8x8xi1>, vector<8x8xf32>
    %209 = arith.addf %202, %208 : vector<8x8xf32>
    %c5_i32 = arith.constant 5 : i32
    %210 = vector.broadcast %c5_i32 : i32 to vector<8x8xi32>
    %211 = arith.cmpi eq, %175, %210 : vector<8x8xi32>
    %cst_65 = arith.constant 0.000000e+00 : f32
    %212 = vector.shape_cast %174 : vector<8x1xf32> to vector<8x1xf32>
    %213 = vector.broadcast %212 : vector<8x1xf32> to vector<8x8xf32>
    %214 = vector.broadcast %cst_65 : f32 to vector<8x8xf32>
    %215 = arith.select %211, %213, %214 : vector<8x8xi1>, vector<8x8xf32>
    %216 = arith.addf %209, %215 : vector<8x8xf32>
    %c6_i32 = arith.constant 6 : i32
    %217 = vector.broadcast %c6_i32 : i32 to vector<8x8xi32>
    %218 = arith.cmpi eq, %175, %217 : vector<8x8xi32>
    %cst_66 = arith.constant 0.000000e+00 : f32
    %219 = vector.shape_cast %170 : vector<8x1xf32> to vector<8x1xf32>
    %220 = vector.broadcast %219 : vector<8x1xf32> to vector<8x8xf32>
    %221 = vector.broadcast %cst_66 : f32 to vector<8x8xf32>
    %222 = arith.select %218, %220, %221 : vector<8x8xi1>, vector<8x8xf32>
    %223 = arith.addf %216, %222 : vector<8x8xf32>
    %cst_67 = arith.constant 0.000000e+00 : f32
    %224 = vector.shape_cast %25 : vector<8x1xi1> to vector<8x1xi1>
    %225 = vector.broadcast %224 : vector<8x1xi1> to vector<8x8xi1>
    %226 = vector.broadcast %cst_67 : f32 to vector<8x8xf32>
    %227 = arith.select %225, %223, %226 : vector<8x8xi1>, vector<8x8xf32>
    %c0_68 = arith.constant 0 : index
    %c0_69 = arith.constant 0 : index
    %228 = vector.load %arg14[%c0_68, %c0_69] : memref<1x8xf32, #tpu.memory_space<vmem>>, vector<1x8xf32>
    %cst_70 = arith.constant dense<0.000000e+00> : vector<8xf32>
    %229 = vector.multi_reduction <add>, %227, %cst_70 [0] : vector<8x8xf32> to vector<8xf32>
    %230 = vector.shape_cast %229 : vector<8xf32> to vector<1x8xf32>
    %231 = arith.addf %228, %230 : vector<1x8xf32>
    %c0_71 = arith.constant 0 : index
    %c0_72 = arith.constant 0 : index
    %232 = vector.load %arg14[%c0_71, %c0_72] : memref<1x8xf32, #tpu.memory_space<vmem>>, vector<1x8xf32>
    tpu.vector_store %arg14[%c0_71, %c0_72], %231 {strides = array<i32>} : memref<1x8xf32, #tpu.memory_space<vmem>>, vector<1x8xf32>,
    %c2_i32_73 = arith.constant 2 : i32
    %233 = arith.cmpi eq, %arg1, %c2_i32_73 : i32
    %234 = arith.extui %233 : i1 to i32
    %c0_i32_74 = arith.constant 0 : i32
    %235 = arith.cmpi ne, %234, %c0_i32_74 : i32
    scf.if %235 {
      %c0_75 = arith.constant 0 : index
      %c0_76 = arith.constant 0 : index
      %236 = vector.load %arg14[%c0_75, %c0_76] : memref<1x8xf32, #tpu.memory_space<vmem>>, vector<1x8xf32>
      %237 = vector.shape_cast %236 : vector<1x8xf32> to vector<1x1x8xf32>
      %c0_77 = arith.constant 0 : index
      %c0_78 = arith.constant 0 : index
      %c0_79 = arith.constant 0 : index
      %238 = vector.load %arg13[%c0_77, %c0_78, %c0_79] : memref<1x1x8xf32, #tpu.memory_space<vmem>>, vector<1x1x8xf32>
      tpu.vector_store %arg13[%c0_77, %c0_78, %c0_79], %237 {strides = array<i32>} : memref<1x1x8xf32, #tpu.memory_space<vmem>>, vector<1x1x8xf32>,
    } else {
    }
    return
  }
  func.func @transform_0(%arg0: i32, %arg1: i32) -> (i32, i32, i32) {
    %c3_i32 = arith.constant 3 : i32
    %0 = arith.muli %arg0, %c3_i32 : i32
    %1 = arith.addi %0, %arg1 : i32
    %c0_i32 = arith.constant 0 : i32
    %c0_i32_0 = arith.constant 0 : i32
    %c0_i32_1 = arith.constant 0 : i32
    return %1, %c0_i32, %c0_i32_0 : i32, i32, i32
  }
  func.func @transform_1(%arg0: i32, %arg1: i32) -> (i32, i32, i32) {
    %c3_i32 = arith.constant 3 : i32
    %0 = arith.muli %arg0, %c3_i32 : i32
    %1 = arith.addi %0, %arg1 : i32
    %c0_i32 = arith.constant 0 : i32
    %c0_i32_0 = arith.constant 0 : i32
    %c0_i32_1 = arith.constant 0 : i32
    return %1, %c0_i32, %c0_i32_0 : i32, i32, i32
  }
  func.func @transform_2(%arg0: i32, %arg1: i32) -> (i32, i32, i32) {
    %c3_i32 = arith.constant 3 : i32
    %0 = arith.muli %arg0, %c3_i32 : i32
    %1 = arith.addi %0, %arg1 : i32
    %c0_i32 = arith.constant 0 : i32
    %c0_i32_0 = arith.constant 0 : i32
    %c0_i32_1 = arith.constant 0 : i32
    return %1, %c0_i32, %c0_i32_0 : i32, i32, i32
  }
  func.func @transform_3(%arg0: i32, %arg1: i32) -> (i32, i32) {
    %c3_i32 = arith.constant 3 : i32
    %0 = arith.muli %arg0, %c3_i32 : i32
    %1 = arith.addi %0, %arg1 : i32
    %c0_i32 = arith.constant 0 : i32
    %c0_i32_0 = arith.constant 0 : i32
    return %1, %c0_i32 : i32, i32
  }
  func.func @transform_4(%arg0: i32, %arg1: i32) -> (i32, i32, i32) {
    %c0_i32 = arith.constant 0 : i32
    %c0_i32_0 = arith.constant 0 : i32
    %c0_i32_1 = arith.constant 0 : i32
    %c0_i32_2 = arith.constant 0 : i32
    return %c0_i32, %c0_i32_0, %c0_i32_1 : i32, i32, i32
  }
  func.func @transform_5(%arg0: i32, %arg1: i32) -> (i32, i32) {
    %c0_i32 = arith.constant 0 : i32
    %c0_i32_0 = arith.constant 0 : i32
    %c0_i32_1 = arith.constant 0 : i32
    return %c0_i32, %c0_i32_0 : i32, i32
  }
  func.func @transform_6(%arg0: i32, %arg1: i32) -> (i32, i32, i32) {
    %c0_i32 = arith.constant 0 : i32
    %c0_i32_0 = arith.constant 0 : i32
    %c0_i32_1 = arith.constant 0 : i32
    %c0_i32_2 = arith.constant 0 : i32
    return %c0_i32, %c0_i32_0, %c0_i32_1 : i32, i32, i32
  }
  func.func @transform_7(%arg0: i32, %arg1: i32) -> (i32, i32, i32) {
    %c0_i32 = arith.constant 0 : i32
    %c0_i32_0 = arith.constant 0 : i32
    %c0_i32_1 = arith.constant 0 : i32
    %c0_i32_2 = arith.constant 0 : i32
    return %c0_i32, %c0_i32_0, %c0_i32_1 : i32, i32, i32
  }
  func.func @transform_8(%arg0: i32, %arg1: i32) -> (i32, i32) {
    %c0_i32 = arith.constant 0 : i32
    %c0_i32_0 = arith.constant 0 : i32
    %c0_i32_1 = arith.constant 0 : i32
    return %c0_i32, %c0_i32_0 : i32, i32
  }
  func.func @transform_9(%arg0: i32, %arg1: i32) -> (i32, i32) {
    %c0_i32 = arith.constant 0 : i32
    %c0_i32_0 = arith.constant 0 : i32
    %c0_i32_1 = arith.constant 0 : i32
    return %c0_i32, %c0_i32_0 : i32, i32
  }
  func.func @transform_10(%arg0: i32, %arg1: i32) -> (i32, i32) {
    %c0_i32 = arith.constant 0 : i32
    %c0_i32_0 = arith.constant 0 : i32
    %c0_i32_1 = arith.constant 0 : i32
    return %c0_i32, %c0_i32_0 : i32, i32
  }
  func.func @transform_11(%arg0: i32, %arg1: i32) -> (i32, i32, i32) {
    %c0_i32 = arith.constant 0 : i32
    %c0_i32_0 = arith.constant 0 : i32
    %c0_i32_1 = arith.constant 0 : i32
    return %arg0, %c0_i32, %c0_i32_0 : i32, i32, i32
  }
}

</mosaic_0001>

<bundles_post_ra>
// kernel: swig_criterion.1
= control target key start
LH: loop header
LB: loop body
LE: loop exit
PB: predicated region body
PF: predicated region fallthrough
CT: control target
= control target key end

     0   :  { %s2096_s17 = smov 0   ;;  %s2098_s18 = smov 0   ;;  %s2834_s0 = inlined_call_operand.vmem [shape: f32[20,8,128], index: 0, kind: input, shape index: {}]   ;;  %s2835_s1 = inlined_call_operand.vmem [shape: f32[20,8,128], index: 1, kind: input, shape index: {}]   ;;  %s2836_s2 = inlined_call_operand.vmem [shape: f32[20,8,128], index: 2, kind: input, shape index: {}]   ;;  %s2837_s3 = inlined_call_operand.vmem [shape: f32[20,128], index: 3, kind: input, shape index: {}]   ;;  %s2838_s4 = inlined_call_operand.vmem [shape: s32[24,8,3], index: 4, kind: input, shape index: {}]   ;;  %s2839_s5 = inlined_call_operand.vmem [shape: f32[24,8], index: 5, kind: input, shape index: {}]   ;;  %s2840_s6 = inlined_call_operand.vmem [shape: f32[24,8,4], index: 6, kind: input, shape index: {}]   ;;  %s2841_s7 = inlined_call_operand.vmem [shape: f32[24,8,4], index: 7, kind: input, shape index: {}]   ;;  %s2842_s8 = inlined_call_operand.vmem [shape: s32[24,1], index: 8, kind: input, shape index: {}]   ;;  %s2843_s9 = inlined_call_operand.vmem [shape: s32[24,1], index: 9, kind: input, shape index: {}]   ;;  %s2844_s10 = inlined_call_operand.vmem [shape: f32[24,1], index: 10, kind: input, shape index: {}]   ;;  %s2845_s11 = inlined_call_operand.vmem [shape: f32[1,1,8], index: 11, kind: output, shape index: {}]  }
   0x1   :  { %s2100_s19 = smov 0  }
   0x2 LB: > { %s30_s20 = sadd.s32 1, %s2025_s18  ;;  %p1792_p0 = scmp.ge.s32.totalorder %s2029_s19, 1  ;;  %s2029_s19 = sphi %s2100_s19, %s21_s19   ;;  %s2025_s18 = sphi %s2098_s18, %s2898_s18   ;;  %s2021_s17 = sphi %s2096_s17, %s2897_s17  }
   0x3   : > { %p31_p1 = scmp.ge.s32.totalorder %s30_s20, 3  ;;  %p437_p2 = scmp.lt.s32.totalorder %s2029_s19, 4 }
   0x5   : > { %s2900_s20 = smov (%p31_p1, %s30_s20), 0  ;;  %p438_p3 = pnand %p1792_p0, %p437_p2 }
   0x6   : > { %2863 = sst [smem:[#allocation3_spill]] %s2900_s20 }
   0x7   : > { %441 = sbr.rel (%p438_p3) target bundleno = 863 (0x35f), region = 64 }
   0xe   : > { %s2117_s21 = sshll.u32 %s2021_s17, 3  ;;  %p565_p4 = scmp.lt.s32.totalorder %s2021_s17, 2 }
   0xf   : > { %p516_p5 = scmp.lt.s32.totalorder %s2117_s21, 19  ;;  %p1800_p6 = scmp.ne.s32.totalorder %s2021_s17, 0 }
  0x10   : > { %s566_s22 = scalar_select %p565_p4, %s2021_s17, 2 }
  0x11   : > { %s517_s23 = scalar_select %p516_p5, %s2117_s21, 19 }
  0x12   : > { %s1799_s24 = sshll.u32 %s566_s22, 3  ;;  %577 = sbr.rel (%p1800_p6) target bundleno = 25 (0x19), region = 68  ;;  %vm578_vm0 = vcmask (!%p1800_p6), 57344   ;;  %v2031_v0 = vmov (!%p1800_p6), 0.0  }
  0x13   : > { %s1794_s25 = sshll.u32 %s517_s23, 3  ;;  %s2126_s28 = scalar_lea.vmem %s2837_s3, %s1799_s24  ;;  %579 = vst.msk [vmem:[#allocation2] sm:$0x1] (!%p1800_p6), %vm578_vm0, %v2031_v0 }
  0x14   : > { %s2131_s12 = scalar_lea.vmem %s2834_s0, %s1794_s25  ;;  %s2136_s15 = scalar_lea.vmem %s2835_s1, %s1794_s25 }
  0x15   : > { %s2141_s22 = scalar_lea.vmem %s2836_s2, %s1794_s25 }
  0x19 PF: > { %s2145_s23 = sshll.u32 %s2021_s17, 6  ;;  %v2032_v1 = vmov 1   ;;  %v2846_v2 = vmov 0   ;;  %v2034_v7 = vmov 2   ;;  %v2181_v12 = vld [vmem:[%s2131_s12 + $0x8] sm:$0xff]  ;;  %v2185_v13 = vld [vmem:[%s2136_s15] sm:$0xff]  ;;  %s2283_s29 = scalar_lea.vmem %s2842_s8, %s2117_s21 }
  0x1a   : > { %1873 = vset.pattern.permute.xlu0 %v2032_v1  ;;  %1871 = vset.pattern.permute.xlu1 %v2846_v2  ;;  %s592_s25 = scalar_lea.vmem %s2838_s4, %s2145_s23  ;;  %v2189_v14 = vld [vmem:[%s2131_s12 + $0x10] sm:$0xff]  ;;  %v2193_v15 = vld [vmem:[%s2131_s12 + $0x18] sm:$0xff]  ;;  %v2197_v16 = vld [vmem:[%s2141_s22] sm:$0xff]  ;;  %s612_s13 = scalar_lea.vmem %s2841_s7, %s2145_s23 }
  0x1b   : > { %v2152_v3 = vld [vmem:[%s592_s25 + $0x8] sm:$0xff]  ;;  %v2156_v4 = vld [vmem:[%s592_s25 + $0x20] sm:$0xff]  ;;  %v2158_v5 = vld [vmem:[%s592_s25 + $0x10] sm:$0xff]  ;;  %s589_s30 = scalar_lea.vmem %s2844_s10, %s2117_s21  ;;  %p1837_p7 = scmp.ne.s32.totalorder %s2021_s17, 2 }
  0x1c   : > { %680 = vperm.xlu0 %1873, %v2152_v3   ;;  %632 = vperm.xlu1 %1871, %v2152_v3   ;;  %v2162_v6 = vld [vmem:[%s592_s25 + $0x30] sm:$0xff]  ;;  %v2167_v8 = vld [vmem:[%s592_s25] sm:$0xff]  ;;  %v2171_v9 = vld [vmem:[%s592_s25 + $0x18] sm:$0xff] }
  0x1d   : > { %v2174_v10 = vld [vmem:[%s592_s25 + $0x28] sm:$0xff]  ;;  %v2177_v11 = vld [vmem:[%s592_s25 + $0x38] sm:$0xff]  ;;  %v2201_v17 = vld [vmem:[%s2131_s12 + $0x20] sm:$0xff]  ;;  %s587_s25 = scalar_lea.vmem %s2843_s9, %s2117_s21 }
  0x1e   : > { %v2205_v18 = vld [vmem:[%s2141_s22 + $0x10] sm:$0xff]  ;;  %v2209_v19 = vld [vmem:[%s2136_s15 + $0x28] sm:$0xff]  ;;  %v2212_v20 = vld [vmem:[%s2131_s12] sm:$0xff] }
  0x1f   : > { %v2216_v21 = vld [vmem:[%s2131_s12 + $0x30] sm:$0xff]  ;;  %v2220_v22 = vld [vmem:[%s2136_s15 + $0x8] sm:$0xff]  ;;  %v2224_v23 = vld [vmem:[%s2141_s22 + $0x20] sm:$0xff] }
  0x20   : > { %689 = vperm.xlu0 %1873, %v2156_v4   ;;  %635 = vperm.xlu1 %1871, %v2158_v5   ;;  %v2228_v24 = vld [vmem:[%s2136_s15 + $0x10] sm:$0xff]  ;;  %v2232_v25 = vld [vmem:[%s2136_s15 + $0x38] sm:$0xff]  ;;  %v2244_v28 = vld [vmem:[%s2141_s22 + $0x8] sm:$0xff] }
  0x21   : > { %v2236_v26 = vld [vmem:[%s2136_s15 + $0x18] sm:$0xff]  ;;  %v2240_v27 = vld [vmem:[%s2141_s22 + $0x30] sm:$0xff]  ;;  %v2249_v29 = vld [vmem:[%s2136_s15 + $0x20] sm:$0xff] }
  0x22   : > { %v2253_v30 = vld [vmem:[%s2131_s12 + $0x28] sm:$0xff]  ;;  %v2257_v31 = vld [vmem:[%s2141_s22 + $0x18] sm:$0xff]  ;;  %v2261_v32 = vld [vmem:[%s2136_s15 + $0x30] sm:$0xff]  ;;  %s2646_s15 = scalar_lea.vmem %s2840_s6, %s2145_s23  ;;  %s601_s23 = scalar_lea.vmem %s2839_s5, %s2117_s21 }
  0x23   : > { %v2265_v33 = vld [vmem:[%s2131_s12 + $0x38] sm:$0xff]  ;;  %v2270_v34 = vld [vmem:[%s2141_s22 + $0x28] sm:$0xff]  ;;  %v584_v36 = vld [vmem:[%s2283_s29] sm:$0xff] }
  0x24   : > { %695 = vperm.xlu0 %1873, %v2162_v6   ;;  %641 = vperm.xlu1 %1871, %v2156_v4   ;;  %v2275_v35 = vld [vmem:[%s2141_s22 + $0x38] sm:$0xff] }
  0x28   : > { %647 = vperm.xlu1 %1871, %v2162_v6   ;;  %1874 = vset.pattern.permute.xlu0 %v2034_v7 }
  0x2c   : > { %1872 = vset.pattern.permute.xlu1 %v2032_v1 }
  0x2d   : > { %677 = vperm.xlu1 %1872, %v2167_v8  }
  0x31   : > { %683 = vperm.xlu1 %1872, %v2158_v5  }
  0x35   : > { %686 = vperm.xlu1 %1872, %v2171_v9  }
  0x39   : > { %692 = vperm.xlu1 %1872, %v2174_v10  }
  0x3d   : > { %698 = vperm.xlu1 %1872, %v2177_v11  }
  0x41   : > { %1875 = vset.pattern.permute.xlu1 %v2034_v7 }
  0x43   : > { %814 = vmax.xlane.f32.xlu0 %v2181_v12 }
  0x47   : > { %1002 = vmax.xlane.f32.xlu0 %v2185_v13 }
  0x4b   : > { %816 = vmax.xlane.f32.xlu0 %v2189_v14 }
  0x4f   : > { %818 = vmax.xlane.f32.xlu0 %v2193_v15 }
  0x53   : > { %1183 = vmax.xlane.f32.xlu0 %v2197_v16 }
  0x57   : > { %820 = vmax.xlane.f32.xlu0 %v2201_v17 }
  0x5b   : > { %1187 = vmax.xlane.f32.xlu0 %v2205_v18 }
  0x5f   : > { %1012 = vmax.xlane.f32.xlu0 %v2209_v19 }
  0x61   : > { %812 = vmax.xlane.f32.xlu1 %v2212_v20 }
  0x63   : > { %824 = vmax.xlane.f32.xlu0 %v2216_v21 }
  0x65   : > { %1004 = vmax.xlane.f32.xlu1 %v2220_v22 }
  0x67   : > { %1191 = vmax.xlane.f32.xlu0 %v2224_v23 }
  0x69   : > { %1006 = vmax.xlane.f32.xlu1 %v2228_v24 }
  0x6b   : > { %1016 = vmax.xlane.f32.xlu0 %v2232_v25 }
  0x6d   : > { %1008 = vmax.xlane.f32.xlu1 %v2236_v26 }
  0x6f   : > { %1195 = vmax.xlane.f32.xlu0 %v2240_v27 }
  0x71   : > { %1185 = vmax.xlane.f32.xlu1 %v2244_v28 }
  0x75   : > { %1010 = vmax.xlane.f32.xlu1 %v2249_v29 }
  0x79   : > { %822 = vmax.xlane.f32.xlu1 %v2253_v30 }
  0x7d   : > { %1189 = vmax.xlane.f32.xlu1 %v2257_v31 }
  0x81   : > { %1014 = vmax.xlane.f32.xlu1 %v2261_v32 }
  0x85   : > { %733 = vperm.xlu0 %1874, %v2167_v8   ;;  %826 = vmax.xlane.f32.xlu1 %v2265_v33 }
  0x89   : > { %739 = vperm.xlu0 %1874, %v2158_v5   ;;  %1193 = vmax.xlane.f32.xlu1 %v2270_v34 }
  0x8d   : > { %748 = vperm.xlu0 %1874, %v2174_v10   ;;  %1197 = vmax.xlane.f32.xlu1 %v2275_v35 }
  0x91   : > { %754 = vperm.xlu0 %1874, %v2177_v11  }
  0x95   : > { %1876 = vset.pattern.permute.xlu0 %v2846_v2 }
  0x96   : > { %625 = vperm.xlu0 %1876, %v584_v36  }
  0x9a   : > { %629 = vperm.xlu0 %1876, %v2167_v8  }
  0x9b   : > { %v2297_v37 = vpop.permute.xlu1 %632  ;;  %v2299_v38 = vpop.permute.xlu0 %680 }
  0x9e   : > { %736 = vperm.xlu1 %1875, %v2152_v3   ;;  %638 = vperm.xlu0 %1876, %v2171_v9  }
  0x9f   : > { %v2301_v39 = vpop.permute.xlu1 %635  ;;  %v2303_v40 = vpop.permute.xlu0 %689 }
  0xa2   : > { %742 = vperm.xlu1 %1875, %v2171_v9   ;;  %644 = vperm.xlu0 %1876, %v2174_v10  }
  0xa3   : > { %v2305_v41 = vpop.permute.xlu1 %641  ;;  %v2307_v42 = vpop.permute.xlu0 %695 }
  0xa6   : > { %745 = vperm.xlu1 %1875, %v2156_v4   ;;  %650 = vperm.xlu0 %1876, %v2177_v11  }
  0xa7   : > { %v2309_v43 = vpop.permute.xlu1 %647 }
  0xaa   : > { %751 = vperm.xlu1 %1875, %v2162_v6  }
  0xac   : > { %v2315_v46 = vpop.permute.xlu1 %677 }
  0xae   : > { %1882 = vset.pattern.permute.xlu1 %v2846_v2 }
  0xb0   : > { %v2321_v51 = vpop.permute.xlu1 %683 }
  0xb4   : > { %v2331_v57 = vpop.permute.xlu1 %686 }
  0xb8   : > { %v2337_v0 = vpop.permute.xlu1 %692 }
  0xbc   : > { %v2347_v8 = vpop.permute.xlu1 %698 }
  0xd0   : > { %v2311_v44 = vpop.xlane.xlu0 %814 }
  0xd1   : > { %v829_v45 = vsub.f32 %v2181_v12, %v2311_v44 }
  0xd3   : > { %v838_v47 = vmul.f32 1.442695, %v829_v45 }
  0xd4   : > { %v2317_v48 = vpop.xlane.xlu0 %1002 }
  0xd5   : > { %1898 = vpow2.f32 %v838_v47  ;;  %v1018_v49 = vsub.f32 %v2185_v13, %v2317_v48 }
  0xd7   : > { %v1026_v50 = vmul.f32 1.442695, %v1018_v49 }
  0xd8   : > { %v2323_v52 = vpop.xlane.xlu0 %816 }
  0xd9   : > { %1900 = vpow2.f32 %v1026_v50  ;;  %v830_v53 = vsub.f32 %v2189_v14, %v2323_v52 }
  0xdb   : > { %v840_v54 = vmul.f32 1.442695, %v830_v53 }
  0xdc   : > { %v2327_v55 = vpop.xlane.xlu0 %818 }
  0xdd   : > { %1902 = vpow2.f32 %v840_v54  ;;  %v831_v56 = vsub.f32 %v2193_v15, %v2327_v55 }
  0xdf   : > { %v1899_v58 = vpop.eup %1898  ;;  %v842_v59 = vmul.f32 1.442695, %v831_v56 }
  0xe0   : > { %v2333_v60 = vpop.xlane.xlu0 %1183  ;;  %854 = vadd.xlane.f32.xlu0 %v1899_v58 }
  0xe1   : > { %1904 = vpow2.f32 %v842_v59  ;;  %v1199_v61 = vsub.f32 %v2197_v16, %v2333_v60 }
  0xe3   : > { %v1901_v62 = vpop.eup %1900  ;;  %v1207_v63 = vmul.f32 1.442695, %v1199_v61 }
  0xe4   : > { %v2339_v1 = vpop.xlane.xlu0 %820  ;;  %1042 = vadd.xlane.f32.xlu0 %v1901_v62 }
  0xe5   : > { %2864 = vst [vmem:[#allocation4_spill] sm:$0xff] %v2339_v1  ;;  %1906 = vpow2.f32 %v1207_v63  ;;  %v832_v3 = vsub.f32 %v2201_v17, %v2339_v1 }
  0xe7   : > { %v1903_v4 = vpop.eup %1902  ;;  %v844_v5 = vmul.f32 1.442695, %v832_v3 }
  0xe8   : > { %v2343_v6 = vpop.xlane.xlu0 %1187  ;;  %856 = vadd.xlane.f32.xlu0 %v1903_v4 }
  0xe9   : > { %2865 = vst [vmem:[#allocation5_spill] sm:$0xff] %v2343_v6  ;;  %1908 = vpow2.f32 %v844_v5  ;;  %v1201_v7 = vsub.f32 %v2205_v18, %v2343_v6 }
  0xeb   : > { %v1905_v9 = vpop.eup %1904  ;;  %v1211_v10 = vmul.f32 1.442695, %v1201_v7 }
  0xec   : > { %v2349_v11 = vpop.xlane.xlu0 %1012  ;;  %858 = vadd.xlane.f32.xlu0 %v1905_v9 }
  0xed   : > { %2866 = vst [vmem:[#allocation6_spill] sm:$0xff] %v2349_v11  ;;  %1910 = vpow2.f32 %v1211_v10  ;;  %v1023_v36 = vsub.f32 %v2209_v19, %v2349_v11 }
  0xee   : > { %v2353_v45 = vpop.xlane.xlu1 %812 }
  0xef   : > { %v1907_v47 = vpop.eup %1906  ;;  %v1036_v49 = vmul.f32 1.442695, %v1023_v36  ;;  %v828_v50 = vsub.f32 %v2212_v20, %v2353_v45 }
  0xf0   : > { %v2357_v53 = vpop.xlane.xlu0 %824  ;;  %1223 = vadd.xlane.f32.xlu0 %v1907_v47 }
  0xf1   : > { %2867 = vst [vmem:[#allocation7_spill] sm:$0xff] %v2357_v53  ;;  %1912 = vpow2.f32 %v1036_v49  ;;  %v836_v54 = vmul.f32 1.442695, %v828_v50  ;;  %v834_v56 = vsub.f32 %v2216_v21, %v2357_v53 }
  0xf2   : > { %v2361_v58 = vpop.xlane.xlu1 %1004 }
  0xf3   : > { %v1909_v59 = vpop.eup %1908  ;;  %1914 = vpow2.f32 %v836_v54  ;;  %v848_v61 = vmul.f32 1.442695, %v834_v56  ;;  %v1019_v62 = vsub.f32 %v2220_v22, %v2361_v58 }
  0xf4   : > { %v2365_v63 = vpop.xlane.xlu0 %1191  ;;  %860 = vadd.xlane.f32.xlu0 %v1909_v59 }
  0xf5   : > { %2868 = vst [vmem:[#allocation8_spill] sm:$0xff] %v2365_v63  ;;  %1916 = vpow2.f32 %v848_v61  ;;  %v1028_v3 = vmul.f32 1.442695, %v1019_v62  ;;  %v1203_v4 = vsub.f32 %v2224_v23, %v2365_v63 }
  0xf6   : > { %v2369_v5 = vpop.xlane.xlu1 %1006 }
  0xf7   : > { %v1911_v7 = vpop.eup %1910  ;;  %1918 = vpow2.f32 %v1028_v3  ;;  %v1215_v9 = vmul.f32 1.442695, %v1203_v4  ;;  %v1020_v10 = vsub.f32 %v2228_v24, %v2369_v5 }
  0xf8   : > { %v2373_v36 = vpop.xlane.xlu0 %1016  ;;  %1227 = vadd.xlane.f32.xlu0 %v1911_v7 }
  0xf9   : > { %2869 = vst [vmem:[#allocation9_spill] sm:$0xff] %v2373_v36  ;;  %1920 = vpow2.f32 %v1215_v9  ;;  %v1030_v47 = vmul.f32 1.442695, %v1020_v10  ;;  %v1025_v49 = vsub.f32 %v2232_v25, %v2373_v36 }
  0xfa   : > { %v2377_v50 = vpop.xlane.xlu1 %1008 }
  0xfb   : > { %v1913_v54 = vpop.eup %1912  ;;  %1922 = vpow2.f32 %v1030_v47  ;;  %v1040_v56 = vmul.f32 1.442695, %v1025_v49  ;;  %v1021_v59 = vsub.f32 %v2236_v26, %v2377_v50 }
  0xfc   : > { %v2381_v61 = vpop.xlane.xlu0 %1195  ;;  %1052 = vadd.xlane.f32.xlu0 %v1913_v54 }
  0xfd   : > { %2870 = vst [vmem:[#allocation10_spill] sm:$0xff] %v2381_v61  ;;  %v1915_v62 = vpop.eup %1914  ;;  %1924 = vpow2.f32 %v1040_v56  ;;  %v1032_v3 = vmul.f32 1.442695, %v1021_v59  ;;  %v1205_v4 = vsub.f32 %v2240_v27, %v2381_v61 }
  0xfe   : > { %852 = vadd.xlane.f32.xlu1 %v1915_v62  ;;  %v2385_v7 = vpop.xlane.xlu1 %1185 }
  0xff   : > { %v1917_v9 = vpop.eup %1916  ;;  %1926 = vpow2.f32 %v1032_v3  ;;  %v1219_v10 = vmul.f32 1.442695, %v1205_v4  ;;  %v1200_v47 = vsub.f32 %v2244_v28, %v2385_v7 }
 0x100   : > { %864 = vadd.xlane.f32.xlu0 %v1917_v9 }
 0x101   : > { %v1919_v49 = vpop.eup %1918  ;;  %1928 = vpow2.f32 %v1219_v10  ;;  %v1209_v2 = vmul.f32 1.442695, %v1200_v47 }
 0x102   : > { %1044 = vadd.xlane.f32.xlu1 %v1919_v49  ;;  %v2389_v54 = vpop.xlane.xlu1 %1010 }
 0x103   : > { %2871 = vst [vmem:[#allocation11_spill] sm:$0xff] %v2389_v54  ;;  %v1921_v56 = vpop.eup %1920  ;;  %1930 = vpow2.f32 %v1209_v2  ;;  %v1022_v59 = vsub.f32 %v2249_v29, %v2389_v54 }
 0x104   : > { %v2393_v62 = vpop.permute.xlu0 %733  ;;  %1231 = vadd.xlane.f32.xlu0 %v1921_v56 }
 0x105   : > { %v1923_v3 = vpop.eup %1922  ;;  %v1034_v4 = vmul.f32 1.442695, %v1022_v59 }
 0x106   : > { %1046 = vadd.xlane.f32.xlu1 %v1923_v3  ;;  %v2395_v61 = vpop.xlane.xlu1 %822 }
 0x107   : > { %2872 = vst [vmem:[#allocation12_spill] sm:$0xff] %v2395_v61  ;;  %v1925_v9 = vpop.eup %1924  ;;  %1932 = vpow2.f32 %v1034_v4  ;;  %v833_v10 = vsub.f32 %v2253_v30, %v2395_v61  ;;  %v2855_v61 = vlaneseq }
 0x108   : > { %v740_v47 = vpop.permute.xlu0 %739  ;;  %1056 = vadd.xlane.f32.xlu0 %v1925_v9 }
 0x109   : > { %v1927_v49 = vpop.eup %1926  ;;  %v846_v2 = vmul.f32 1.442695, %v833_v10 }
 0x10a   : > { %1048 = vadd.xlane.f32.xlu1 %v1927_v49  ;;  %v2399_v36 = vpop.xlane.xlu1 %1189 }
 0x10b   : > { %2873 = vst [vmem:[#allocation13_spill] sm:$0xff] %v2399_v36  ;;  %v1929_v53 = vpop.eup %1928  ;;  %1934 = vpow2.f32 %v846_v2  ;;  %v1202_v56 = vsub.f32 %v2257_v31, %v2399_v36 }
 0x10c   : > { %v2403_v59 = vpop.permute.xlu0 %748  ;;  %1235 = vadd.xlane.f32.xlu0 %v1929_v53 }
 0x10d   : > { %v1931_v3 = vpop.eup %1930  ;;  %v1213_v4 = vmul.f32 1.442695, %v1202_v56 }
 0x10e   : > { %1225 = vadd.xlane.f32.xlu1 %v1931_v3  ;;  %v2405_v63 = vpop.xlane.xlu1 %1014  ;;  %v2416_v3 = vand.u32 127, %v2855_v61 }
 0x10f   : > { %2874 = vst [vmem:[#allocation14_spill] sm:$0xff] %v2405_v63  ;;  %1936 = vpow2.f32 %v1213_v4  ;;  %v1024_v9 = vsub.f32 %v2261_v32, %v2405_v63 }
 0x110   : > { %v2409_v10 = vpop.permute.xlu0 %754  ;;  %vm700_vm1 = vcmp.eq.s32.totalorder %v2416_v3, %v2315_v46  ;;  %vm702_vm2 = vcmp.eq.s32.totalorder %v2416_v3, %v2321_v51  ;;  %vm701_vm3 = vcmp.eq.s32.totalorder %v2416_v3, %v2299_v38  ;;  %vm653_vm4 = vcmp.eq.s32.totalorder %v2416_v3, %v2297_v37 }
 0x111   : > { %v1933_v49 = vpop.eup %1932  ;;  %v1038_v2 = vmul.f32 1.442695, %v1024_v9  ;;  %vm654_vm5 = vcmp.eq.s32.totalorder %v2416_v3, %v2301_v39  ;;  %v2035_v46 = vmov 0.0   ;;  %vm756_vm6 = vcmp.eq.s32.totalorder %v2416_v3, %v2393_v62 }
 0x112   : > { %1050 = vadd.xlane.f32.xlu1 %v1933_v49  ;;  %v2411_v11 = vpop.xlane.xlu1 %826  ;;  %vm758_vm7 = vcmp.eq.s32.totalorder %v2416_v3, %v740_v47  ;;  %v1812_v62 = vsel %vm701_vm3, 1.0, %v2035_v46  ;;  %v1804_v47 = vsel %vm653_vm4, 1.0, %v2035_v46  ;;  %vm703_vm10 = vcmp.eq.s32.totalorder %v2416_v3, %v2331_v57 }
 0x113   : > { %2875 = vst [vmem:[#allocation15_spill] sm:$0xff] %v2411_v11  ;;  %1938 = vpow2.f32 %v1038_v2  ;;  %v835_v53 = vsub.f32 %v2265_v33, %v2411_v11  ;;  %v725_v54 = vadd.f32 %v1812_v62, %v1804_v47  ;;  %vm656_vm12 = vcmp.eq.s32.totalorder %v2416_v3, %v2305_v41 }
 0x114   : > { %vm704_vm14 = vcmp.eq.s32.totalorder %v2416_v3, %v2303_v40  ;;  %vm761_vm3 = vcmp.eq.s32.totalorder %v2416_v3, %v2403_v59  ;;  %vm706_vm4 = vcmp.eq.s32.totalorder %v2416_v3, %v2307_v42 }
 0x115   : > { %v1935_v56 = vpop.eup %1934  ;;  %v850_v4 = vmul.f32 1.442695, %v835_v53  ;;  %v2418_v36 = vpop.permute.xlu0 %625 }
 0x116   : > { %2876 = vst [vmem:[#allocation16_spill] sm:$0xff] %v2418_v36  ;;  %862 = vadd.xlane.f32.xlu1 %v1935_v56  ;;  %v2420_v63 = vpop.xlane.xlu1 %1193  ;;  %v1811_v56 = vsel %vm700_vm1, 1.0, %v2035_v46  ;;  %v1819_v36 = vsel %vm756_vm6, 1.0, %v2035_v46  ;;  %vm705_vm1 = vcmp.eq.s32.totalorder %v2416_v3, %v2337_v0 }
 0x117   : > { %2877 = vst [vmem:[#allocation17_spill] sm:$0xff] %v2420_v63  ;;  %1940 = vpow2.f32 %v850_v4  ;;  %v1204_v9 = vsub.f32 %v2270_v34, %v2420_v63  ;;  %v1813_v4 = vsel %vm702_vm2, 1.0, %v2035_v46  ;;  %vm658_vm2 = vcmp.eq.s32.totalorder %v2416_v3, %v2309_v43 }
 0x118   : > { %v1824_v43 = vsel %vm761_vm3, 1.0, %v2035_v46  ;;  %vm976_vm3 = vcmask 1043459  }
 0x119   : > { %v1937_v49 = vpop.eup %1936  ;;  %v1217_v2 = vmul.f32 1.442695, %v1204_v9  ;;  %v630_v53 = vpop.permute.xlu0 %629 }
 0x11a   : > { %vm652_vm8 = vcmp.eq.s32.totalorder %v2416_v3, %v630_v53  ;;  %1229 = vadd.xlane.f32.xlu1 %v1937_v49  ;;  %v2439_v51 = vpop.xlane.xlu1 %1197 }
 0x11b   : > { %2878 = vst [vmem:[#allocation18_spill] sm:$0xff] %v2439_v51  ;;  %1942 = vpow2.f32 %v1217_v2  ;;  %v1803_v61 = vsel %vm652_vm8, 1.0, %v2035_v46  ;;  %v1206_v9 = vsub.f32 %v2275_v35, %v2439_v51  ;;  %v1805_v2 = vsel %vm654_vm5, 1.0, %v2035_v46 }
 0x11c   : > { %v724_v49 = vadd.f32 %v1811_v56, %v1803_v61  ;;  %v1821_v51 = vsel %vm758_vm7, 1.0, %v2035_v46  ;;  %v726_v38 = vadd.f32 %v1813_v4, %v1805_v2  ;;  %vm707_vm7 = vcmp.eq.s32.totalorder %v2416_v3, %v2347_v8 }
 0x11d   : > { %v1939_v53 = vpop.eup %1938  ;;  %v1221_v63 = vmul.f32 1.442695, %v1206_v9  ;;  %v639_v11 = vpop.permute.xlu0 %638  ;;  %vm763_vm8 = vcmp.eq.s32.totalorder %v2416_v3, %v2409_v10 }
 0x11e   : > { %v780_v1 = vadd.f32 %v1819_v36, %v724_v49  ;;  %vm655_vm9 = vcmp.eq.s32.totalorder %v2416_v3, %v639_v11  ;;  %1054 = vadd.xlane.f32.xlu1 %v1939_v53  ;;  %v737_v37 = vpop.permute.xlu1 %736  ;;  %v782_v39 = vadd.f32 %v1821_v51, %v726_v38  ;;  %v1814_v36 = vsel %vm703_vm10, 1.0, %v2035_v46 }
 0x11f   : > { %1944 = vpow2.f32 %v1221_v63  ;;  %vm757_vm11 = vcmp.eq.s32.totalorder %v2416_v3, %v737_v37  ;;  %v1806_v56 = vsel %vm655_vm9, 1.0, %v2035_v46 }
 0x120   : > { %v788_v61 = vmul.f32 0.8, %v780_v1  ;;  %v1820_v9 = vsel %vm757_vm11, 1.0, %v2035_v46  ;;  %v727_v57 = vadd.f32 %v1814_v36, %v1806_v56  ;;  %v790_v63 = vmul.f32 0.8, %v782_v39 }
 0x121   : > { %v1941_v6 = vpop.eup %1940  ;;  %v781_v4 = vadd.f32 %v1820_v9, %v725_v54  ;;  %v1807_v54 = vsel %vm656_vm12, 1.0, %v2035_v46  ;;  %v645_v41 = vpop.permute.xlu0 %644 }
 0x122   : > { %v796_v11 = vadd.f32 0.0046875, %v788_v61  ;;  %866 = vadd.xlane.f32.xlu1 %v1941_v6  ;;  %v743_v49 = vpop.permute.xlu1 %742  ;;  %v798_v2 = vadd.f32 0.0046875, %v790_v63  ;;  %vm657_vm0 = vcmp.eq.s32.totalorder %v2416_v3, %v645_v41 }
 0x123   : > { %vm759_vm13 = vcmp.eq.s32.totalorder %v2416_v3, %v743_v49  ;;  %v789_v51 = vmul.f32 0.8, %v781_v4  ;;  %v1808_v49 = vsel %vm657_vm0, 1.0, %v2035_v46 }
 0x124   : > { %v1822_v1 = vsel %vm759_vm13, 1.0, %v2035_v46  ;;  %v892_v62 = vmul.f32 %v2212_v20, %v796_v11  ;;  %v1082_v39 = vmul.f32 %v2185_v13, %v796_v11  ;;  %v1815_v20 = vsel %vm704_vm14, 1.0, %v2035_v46 }
 0x125   : > { %v1943_v47 = vpop.eup %1942  ;;  %v783_v53 = vadd.f32 %v1822_v1, %v727_v57  ;;  %v797_v38 = vadd.f32 0.0046875, %v789_v51  ;;  %v728_v9 = vadd.f32 %v1815_v20, %v1807_v54  ;;  %v894_v13 = vmul.f32 %v2189_v14, %v798_v2  ;;  %v651_v59 = vpop.permute.xlu0 %650 }
 0x126   : > { %1233 = vadd.xlane.f32.xlu1 %v1943_v47  ;;  %v746_v6 = vpop.permute.xlu1 %745  ;;  %900 = vadd.xlane.f32.xlu0 %v892_v62  ;;  %v1816_v57 = vsel %vm705_vm1, 1.0, %v2035_v46  ;;  %v1809_v14 = vsel %vm658_vm2, 1.0, %v2035_v46  ;;  %vm659_vm6 = vcmp.eq.s32.totalorder %v2416_v3, %v651_v59  ;;  %vm972_vm1 = vcmask 1041409  }
 0x127   : > { %vm760_vm15 = vcmp.eq.s32.totalorder %v2416_v3, %v746_v6  ;;  %v791_v37 = vmul.f32 0.8, %v783_v53  ;;  %v893_v36 = vmul.f32 %v2181_v12, %v797_v38  ;;  %v729_v63 = vadd.f32 %v1816_v57, %v1808_v49  ;;  %v2546_v49 = vld [vmem:[%s612_s13 + $0x10] sm:$0xff] }
 0x128   : > { %v1823_v56 = vsel %vm760_vm15, 1.0, %v2035_v46  ;;  %v1083_v1 = vmul.f32 %v2220_v22, %v797_v38  ;;  %v1084_v53 = vmul.f32 %v2228_v24, %v798_v2  ;;  %v1263_v22 = vmul.f32 %v2197_v16, %v796_v11  ;;  %v2550_v57 = vld [vmem:[%s612_s13 + $0x30] sm:$0xff] }
 0x129   : > { %v1945_v61 = vpop.eup %1944  ;;  %v2481_v40 = vadd.f32 0.0046875, %v791_v37  ;;  %v784_v4 = vadd.f32 %v1823_v56, %v728_v9  ;;  %v785_v62 = vadd.f32 %v1824_v43, %v729_v63  ;;  %v1810_v16 = vsel %vm659_vm6, 1.0, %v2035_v46 }
 0x12a   : > { %1237 = vadd.xlane.f32.xlu1 %v1945_v61  ;;  %1090 = vadd.xlane.f32.xlu0 %v1082_v39  ;;  %v752_v0 = vpop.permute.xlu1 %751  ;;  %v1818_v11 = vsel %vm707_vm7, 1.0, %v2035_v46  ;;  %v1265_v39 = vmul.f32 %v2205_v18, %v798_v2  ;;  %v1264_v56 = vmul.f32 %v2244_v28, %v797_v38  ;;  %vm1381_vm13 = vcmp.ne.f32.partialorder %v2546_v49, -1.0 }
 0x12b   : > { %v792_v51 = vmul.f32 0.8, %v784_v4  ;;  %v895_v12 = vmul.f32 %v2193_v15, %v2481_v40  ;;  %vm762_vm5 = vcmp.eq.s32.totalorder %v2416_v3, %v752_v0  ;;  %v1817_v15 = vsel %vm706_vm4, 1.0, %v2035_v46  ;;  %v2552_v0 = vld [vmem:[%s612_s13 + $0x38] sm:$0xff] }
 0x12c   : > { %v1825_v6 = vsel %vm762_vm5, 1.0, %v2035_v46  ;;  %v730_v42 = vadd.f32 %v1817_v15, %v1809_v14  ;;  %v793_v54 = vmul.f32 0.8, %v785_v62  ;;  %v1085_v37 = vmul.f32 %v2236_v26, %v2481_v40 }
 0x12d   : > { %v800_v47 = vadd.f32 0.0046875, %v792_v51  ;;  %v731_v8 = vadd.f32 %v1818_v11, %v1810_v16  ;;  %vm1385_vm15 = vcmp.ne.f32.partialorder %v2550_v57, -1.0  ;;  %vm1386_vm0 = vcmp.ne.f32.partialorder %v2552_v0, -1.0 }
 0x12e   : > { %902 = vadd.xlane.f32.xlu1 %v893_v36  ;;  %904 = vadd.xlane.f32.xlu0 %v894_v13  ;;  %v786_v41 = vadd.f32 %v1825_v6, %v730_v42  ;;  %v801_v61 = vadd.f32 0.0046875, %v793_v54  ;;  %v1266_v13 = vmul.f32 %v2257_v31, %v2481_v40  ;;  %v2533_v31 = vld [vmem:[%s612_s13 + $0x8] sm:$0xff]  ;;  %v1830_v14 = vsel %vm1381_vm13, 1.0, %v2035_v46 }
 0x12f   : > { %v896_v24 = vmul.f32 %v2201_v17, %v800_v47  ;;  %v1826_v17 = vsel %vm763_vm8, 1.0, %v2035_v46  ;;  %v1086_v4 = vmul.f32 %v2249_v29, %v800_v47  ;;  %v1267_v38 = vmul.f32 %v2224_v23, %v800_v47 }
 0x130   : > { %v794_v20 = vmul.f32 0.8, %v786_v41  ;;  %v787_v26 = vadd.f32 %v1826_v17, %v731_v8  ;;  %v1087_v36 = vmul.f32 %v2209_v19, %v801_v61  ;;  %v897_v2 = vmul.f32 %v2253_v30, %v801_v61  ;;  %v2531_v30 = vld [vmem:[%s612_s13] sm:$0xff] }
 0x131   : > { %v1268_v23 = vmul.f32 %v2270_v34, %v801_v61  ;;  %vm1379_vm9 = vcmp.ne.f32.partialorder %v2531_v30, -1.0  ;;  %vm1380_vm10 = vcmp.ne.f32.partialorder %v2533_v31, -1.0  ;;  %v1834_v59 = vsel %vm1385_vm15, 1.0, %v2035_v46  ;;  %v2565_v41 = vld [vmem:[%s2126_s28] sm:$0xff] }
 0x132   : > { %1092 = vadd.xlane.f32.xlu1 %v1083_v1  ;;  %906 = vadd.xlane.f32.xlu0 %v895_v12  ;;  %v802_v9 = vadd.f32 0.0046875, %v794_v20  ;;  %v795_v10 = vmul.f32 0.8, %v787_v26  ;;  %v1828_v40 = vsel %vm1379_vm9, 1.0, %v2035_v46  ;;  %v1829_v34 = vsel %vm1380_vm10, 1.0, %v2035_v46 }
 0x133   : > { %v1877_v63 = vpack.i.bf16 %v1829_v34, %v1828_v40  ;;  %v1835_v62 = vsel %vm1386_vm0, 1.0, %v2035_v46  ;;  %vm974_vm2 = vcmask 1042434   ;;  %vm978_vm4 = vcmask 1044484  }
 0x134   : > { %v898_v18 = vmul.f32 %v2216_v21, %v802_v9  ;;  %v803_v28 = vadd.f32 0.0046875, %v795_v10  ;;  %v1088_v19 = vmul.f32 %v2261_v32, %v802_v9  ;;  %v1269_v32 = vmul.f32 %v2240_v27, %v802_v9  ;;  %v2548_v27 = vld [vmem:[%s612_s13 + $0x18] sm:$0xff] }
 0x135   : > { %vm1382_vm14 = vcmp.ne.f32.partialorder %v2548_v27, -1.0  ;;  %vm980_vm5 = vcmask 1045509   ;;  %vm984_vm6 = vcmask 1047559   ;;  %vm982_vm7 = vcmask 1046534  }
 0x136   : > { %1094 = vadd.xlane.f32.xlu1 %v1084_v53  ;;  %1271 = vadd.xlane.f32.xlu0 %v1263_v22  ;;  %v1089_v29 = vmul.f32 %v2232_v25, %v803_v28  ;;  %v899_v21 = vmul.f32 %v2265_v33, %v803_v28  ;;  %v2538_v25 = vld [vmem:[%s612_s13 + $0x20] sm:$0xff]  ;;  %v2540_v33 = vld [vmem:[%s612_s13 + $0x28] sm:$0xff]  ;;  %v1831_v43 = vsel %vm1382_vm14, 1.0, %v2035_v46  ;;  %v1893_v53 = vpack.i.bf16 %v1835_v62, %v1834_v59 }
 0x137   : > { %vm1383_vm11 = vcmp.ne.f32.partialorder %v2538_v25, -1.0  ;;  %vm1384_vm12 = vcmp.ne.f32.partialorder %v2540_v33, -1.0  ;;  %v1883_v47 = vpack.i.bf16 %v1831_v43, %v1830_v14  ;;  %v1270_v16 = vmul.f32 %v2275_v35, %v803_v28 }
 0x138   : > { %v1832_v51 = vsel %vm1383_vm11, 1.0, %v2035_v46  ;;  %v1833_v1 = vsel %vm1384_vm12, 1.0, %v2035_v46  ;;  %vm1523_vm9 = vcmask 31744   ;;  %vm988_vm10 = vcmask 64512  }
 0x139   : > { %v1888_v12 = vpack.i.bf16 %v1833_v1, %v1832_v51  ;;  %vm1609_vm14 = vcmp.eq.s32.totalorder %v2416_v3, 0  ;;  %vm1616_vm15 = vcmp.eq.s32.totalorder %v2416_v3, 1  ;;  %vm1624_vm0 = vcmp.eq.s32.totalorder %v2416_v3, 2 }
 0x13a   : > { %1096 = vadd.xlane.f32.xlu1 %v1085_v37  ;;  %908 = vadd.xlane.f32.xlu0 %v896_v24 }
 0x13e   : > { %1273 = vadd.xlane.f32.xlu1 %v1264_v56  ;;  %1275 = vadd.xlane.f32.xlu0 %v1265_v39 }
 0x142   : > { %1098 = vadd.xlane.f32.xlu1 %v1086_v4  ;;  %1100 = vadd.xlane.f32.xlu0 %v1087_v36 }
 0x146   : > { %912 = vadd.xlane.f32.xlu0 %v898_v18  ;;  %910 = vadd.xlane.f32.xlu1 %v897_v2 }
 0x14a   : > { %1279 = vadd.xlane.f32.xlu0 %v1267_v38  ;;  %1277 = vadd.xlane.f32.xlu1 %v1266_v13 }
 0x14e   : > { %1102 = vadd.xlane.f32.xlu1 %v1088_v19  ;;  %1104 = vadd.xlane.f32.xlu0 %v1089_v29 }
 0x152   : > { %914 = vadd.xlane.f32.xlu1 %v899_v21 }
 0x156   : > { %1281 = vadd.xlane.f32.xlu1 %v1268_v23 }
 0x15a   : > { %1283 = vadd.xlane.f32.xlu1 %v1269_v32 }
 0x164   : > { %1878 = vperm.xlu0 %1876, %v1877_v63  }
 0x168   : > { %1889 = vperm.xlu0 %1876, %v1888_v12   ;;  %v2879_v12 = vlaneseq }
 0x16a   : > { %v941_v14 = vshrl.u32 %v2879_v12, 7 }
 0x16b   : > { %1884 = vperm.xlu1 %1882, %v1883_v47  }
 0x16c   : > { %1894 = vperm.xlu0 %1876, %v1893_v53  }
 0x16d   : > { %v855_v22 = vpop.xlane.xlu0 %854 }
 0x171   : > { %v1043_v15 = vpop.xlane.xlu0 %1042 }
 0x175   : > { %v857_v6 = vpop.xlane.xlu0 %856 }
 0x179   : > { %v859_v42 = vpop.xlane.xlu0 %858 }
 0x17d   : > { %v1224_v54 = vpop.xlane.xlu0 %1223 }
 0x181   : > { %v861_v37 = vpop.xlane.xlu0 %860 }
 0x185   : > { %v1228_v39 = vpop.xlane.xlu0 %1227 }
 0x189   : > { %v1053_v8 = vpop.xlane.xlu0 %1052 }
 0x18b   : > { %v853_v24 = vpop.xlane.xlu1 %852  ;;  %1357 = vmax.xlane.f32.xlu0 %v2565_v41 }
 0x18c   : > { %1946 = vlog2.f32 %v853_v24  ;;  %v2593_v24 = vsub.s32 %v2416_v3, %v941_v14 }
 0x18d   : > { %v865_v17 = vpop.xlane.xlu0 %864  ;;  %1948 = vlog2.f32 %v855_v22 }
 0x18e   : > { %1950 = vlog2.f32 %v857_v6 }
 0x18f   : > { %v1045_v11 = vpop.xlane.xlu1 %1044  ;;  %1285 = vadd.xlane.f32.xlu1 %v1270_v16  ;;  %1952 = vlog2.f32 %v1043_v15 }
 0x190   : > { %1954 = vlog2.f32 %v859_v42 }
 0x191   : > { %v2569_v9 = vpop.xlane.xlu0 %1231  ;;  %1956 = vlog2.f32 %v1045_v11 }
 0x192   : > { %1958 = vlog2.f32 %v1224_v54 }
 0x193   : > { %v1047_v61 = vpop.xlane.xlu1 %1046 }
 0x194   : > { %1960 = vlog2.f32 %v1047_v61 }
 0x195   : > { %v2575_v35 = vpop.xlane.xlu0 %1056 }
 0x196   : > { %v1947_v18 = vpop.eup %1946 }
 0x197   : > { %v1049_v20 = vpop.xlane.xlu1 %1048  ;;  %v1949_v2 = vpop.eup %1948  ;;  %v869_v29 = vmul.f32 0.6931472, %v1947_v18 }
 0x198   : > { %v1951_v28 = vpop.eup %1950  ;;  %1962 = vlog2.f32 %v1049_v20  ;;  %v871_v32 = vmul.f32 0.6931472, %v1949_v2 }
 0x199   : > { %v2579_v38 = vpop.xlane.xlu0 %1235  ;;  %v1953_v19 = vpop.eup %1952  ;;  %v873_v40 = vmul.f32 0.6931472, %v1951_v28  ;;  %1964 = vlog2.f32 %v1228_v39  ;;  %v884_v59 = vadd.f32 %v869_v29, %v2353_v45 }
 0x19a   : > { %v1955_v21 = vpop.eup %1954  ;;  %v1059_v34 = vmul.f32 0.6931472, %v1953_v19  ;;  %v885_v53 = vadd.f32 %v871_v32, %v2311_v44 }
 0x19b   : > { %v1226_v56 = vpop.xlane.xlu1 %1225  ;;  %v1957_v23 = vpop.eup %1956  ;;  %v875_v43 = vmul.f32 0.6931472, %v1955_v21  ;;  %v886_v22 = vadd.f32 %v873_v40, %v2323_v52  ;;  %v916_v16 = vmul.f32 3.0, %v884_v59 }
 0x19c   : > { %v1959_v1 = vpop.eup %1958  ;;  %v1061_v62 = vmul.f32 0.6931472, %v1957_v23  ;;  %1966 = vlog2.f32 %v1226_v56  ;;  %v1074_v42 = vadd.f32 %v1059_v34, %v2317_v48  ;;  %v917_v61 = vmul.f32 3.0, %v885_v53 }
 0x19d   : > { %v1240_v15 = vmul.f32 0.6931472, %v1959_v1  ;;  %v887_v11 = vadd.f32 %v875_v43, %v2327_v55  ;;  %1968 = vlog2.f32 %v861_v37  ;;  %v918_v20 = vmul.f32 3.0, %v886_v22 }
 0x19e   : > { %v1961_v47 = vpop.eup %1960  ;;  %v1075_v39 = vadd.f32 %v1061_v62, %v2361_v58  ;;  %1970 = vlog2.f32 %v1053_v8  ;;  %v1106_v56 = vmul.f32 3.0, %v1074_v42 }
 0x19f   : > { %v1051_v26 = vpop.xlane.xlu1 %1050  ;;  %v1063_v45 = vmul.f32 0.6931472, %v1961_v47  ;;  %1972 = vlog2.f32 %v865_v17  ;;  %v1255_v2 = vadd.f32 %v1240_v15, %v2333_v60  ;;  %v919_v19 = vmul.f32 3.0, %v887_v11 }
 0x1a0   : > { %1974 = vlog2.f32 %v1051_v26  ;;  %v1107_v29 = vmul.f32 3.0, %v1075_v39 }
 0x1a1   : > { %1976 = vlog2.f32 %v2569_v9  ;;  %v1076_v8 = vadd.f32 %v1063_v45, %v2369_v5 }
 0x1a2   : > { %v1963_v44 = vpop.eup %1962  ;;  %1978 = vlog2.f32 %v2575_v35 }
 0x1a3   : > { %v2571_v4 = vpop.xlane.xlu1 %862  ;;  %v1965_v28 = vpop.eup %1964  ;;  %v1065_v58 = vmul.f32 0.6931472, %v1963_v44  ;;  %v1108_v14 = vmul.f32 3.0, %v1076_v8 }
 0x1a4   : > { %v1244_v60 = vmul.f32 0.6931472, %v1965_v28  ;;  %1980 = vlog2.f32 %v2571_v4 }
 0x1a5   : > { %v1077_v43 = vadd.f32 %v1065_v58, %v2377_v50 }
 0x1a6   : > { %v1967_v40 = vpop.eup %1966 }
 0x1a7   : > { %v2573_v36 = vpop.xlane.xlu1 %1229  ;;  %v1242_v59 = vmul.f32 0.6931472, %v1967_v40  ;;  %v1969_v53 = vpop.eup %1968  ;;  %v1109_v39 = vmul.f32 3.0, %v1077_v43 }
 0x1a8   : > { %1982 = vlog2.f32 %v2573_v36  ;;  %v1971_v15 = vpop.eup %1970 }
 0x1a9   : > { %v1256_v44 = vadd.f32 %v1242_v59, %v2385_v7  ;;  %v877_v7 = vmul.f32 0.6931472, %v1969_v53  ;;  %v2883_v53 = vld [vmem:[#allocation6_spill] sm:$0xff] }
 0x1ab   : > { %v2577_v10 = vpop.xlane.xlu1 %1054 }
 0x1ac   : > { %1984 = vlog2.f32 %v2577_v10 }
 0x1af   : > { %v2581_v13 = vpop.xlane.xlu1 %866 }
 0x1b0   : > { %1986 = vlog2.f32 %v2581_v13  ;;  %v2881_v13 = vld [vmem:[#allocation11_spill] sm:$0xff] }
 0x1b3   : > { %v2583_v63 = vpop.xlane.xlu1 %1233  ;;  %v901_v51 = vpop.xlane.xlu0 %900 }
 0x1b4   : > { %v924_v52 = vsub.f32 %v916_v16, %v901_v51  ;;  %v1287_v51 = vmul.f32 3.0, %v1255_v2  ;;  %v1973_v16 = vpop.eup %1972  ;;  %1988 = vlog2.f32 %v2583_v63 }
 0x1b5   : > { %v1975_v11 = vpop.eup %1974  ;;  %1990 = vlog2.f32 %v2579_v38 }
 0x1b6   : > { %v943_v21 = vrot.slane %v924_v52, %v2593_v24  ;;  %v2880_v52 = vld [vmem:[#allocation5_spill] sm:$0xff]  ;;  %v1977_v10 = vpop.eup %1976  ;;  %v1067_v28 = vmul.f32 0.6931472, %v1975_v11 }
 0x1b7   : > { %v2589_v6 = vpop.xlane.xlu1 %1237  ;;  %v1091_v54 = vpop.xlane.xlu0 %1090  ;;  %v2885_v11 = vld [vmem:[#allocation13_spill] sm:$0xff] }
 0x1b8   : > { %v1114_v17 = vsub.f32 %v1106_v56, %v1091_v54  ;;  %v1979_v2 = vpop.eup %1978 }
 0x1ba   : > { %v1133_v35 = vrot.slane %v1114_v17, %v2593_v24  ;;  %v1069_v17 = vmul.f32 0.6931472, %v1971_v15 }
 0x1bb   : > { %v903_v48 = vpop.xlane.xlu1 %902  ;;  %v905_v18 = vpop.xlane.xlu0 %904 }
 0x1bc   : > { %v925_v55 = vsub.f32 %v917_v61, %v903_v48  ;;  %v926_v37 = vsub.f32 %v918_v20, %v905_v18  ;;  %v1257_v61 = vadd.f32 %v1244_v60, %v2880_v52  ;;  %v1079_v63 = vadd.f32 %v1069_v17, %v2883_v53 }
 0x1be   : > { %v947_v23 = vrot.slane %v925_v55, %v2593_v24  ;;  %v951_v32 = vrot.slane %v926_v37, %v2593_v24  ;;  %v1981_v55 = vpop.eup %1980  ;;  %v1289_v58 = vmul.f32 3.0, %v1257_v61 }
 0x1bf   : > { %v1093_v26 = vpop.xlane.xlu1 %1092  ;;  %v907_v34 = vpop.xlane.xlu0 %906 }
 0x1c0   : > { %v973_v9 = vsel %vm972_vm1, %v947_v23, %v943_v21  ;;  %v1115_v5 = vsub.f32 %v1107_v29, %v1093_v26  ;;  %v927_v1 = vsub.f32 %v919_v19, %v907_v34  ;;  %v1288_v19 = vmul.f32 3.0, %v1256_v44  ;;  %v1983_v29 = vpop.eup %1982 }
 0x1c1   : > { %v975_v12 = vsel %vm974_vm2, %v951_v32, %v973_v9  ;;  %v1985_v60 = vpop.eup %1984  ;;  %v1248_v26 = vmul.f32 0.6931472, %v1977_v10  ;;  %v879_v34 = vmul.f32 0.6931472, %v1981_v55  ;;  %v1246_v9 = vmul.f32 0.6931472, %v1983_v29 }
 0x1c2   : > { %v1137_v62 = vrot.slane %v1115_v5, %v2593_v24  ;;  %v955_v47 = vrot.slane %v927_v1, %v2593_v24  ;;  %v1987_v52 = vpop.eup %1986  ;;  %v2889_v55 = vld [vmem:[#allocation9_spill] sm:$0xff] }
 0x1c3   : > { %v1095_v4 = vpop.xlane.xlu1 %1094  ;;  %v1272_v22 = vpop.xlane.xlu0 %1271 }
 0x1c4   : > { %v1162_v36 = vsel %vm972_vm1, %v1137_v62, %v1133_v35  ;;  %v2615_v42 = vsel %vm976_vm3, %v955_v47, %v975_v12  ;;  %v1116_v54 = vsub.f32 %v1108_v14, %v1095_v4  ;;  %v1295_v50 = vsub.f32 %v1287_v51, %v1272_v22  ;;  %v2882_v14 = vld [vmem:[#allocation4_spill] sm:$0xff] }
 0x1c5   : > { %v1078_v51 = vadd.f32 %v1067_v28, %v2881_v13  ;;  %v888_v43 = vadd.f32 %v877_v7, %v2882_v14  ;;  %v881_v62 = vmul.f32 0.6931472, %v1973_v16  ;;  %v1073_v4 = vmul.f32 0.6931472, %v1979_v2  ;;  %v2888_v2 = vld [vmem:[#allocation14_spill] sm:$0xff] }
 0x1c6   : > { %v1141_v45 = vrot.slane %v1116_v54, %v2593_v24  ;;  %v1314_v5 = vrot.slane %v1295_v50, %v2593_v24  ;;  %v1071_v22 = vmul.f32 0.6931472, %v1985_v60  ;;  %v2884_v54 = vld [vmem:[#allocation12_spill] sm:$0xff] }
 0x1c7   : > { %v1097_v20 = vpop.xlane.xlu1 %1096  ;;  %v2620_v56 = vpop.xlane.xlu0 %908  ;;  %v889_v50 = vadd.f32 %v879_v34, %v2884_v54  ;;  %v920_v10 = vmul.f32 3.0, %v888_v43  ;;  %v2890_v43 = vld [vmem:[#allocation15_spill] sm:$0xff] }
 0x1c8   : > { %v1163_v48 = vsel %vm974_vm2, %v1141_v45, %v1162_v36  ;;  %v1117_v18 = vsub.f32 %v1109_v39, %v1097_v20  ;;  %v1110_v36 = vmul.f32 3.0, %v1078_v51  ;;  %v1258_v45 = vadd.f32 %v1246_v9, %v2885_v11  ;;  %v2886_v39 = vld [vmem:[#allocation8_spill] sm:$0xff] }
 0x1c9   : > { %v1259_v44 = vadd.f32 %v1248_v26, %v2886_v39  ;;  %v1111_v20 = vmul.f32 3.0, %v1079_v63  ;;  %v1080_v28 = vadd.f32 %v1071_v22, %v2888_v2 }
 0x1ca   : > { %v1145_v37 = vrot.slane %v1117_v18, %v2593_v24  ;;  %v1290_v29 = vmul.f32 3.0, %v1258_v45 }
 0x1cb   : > { %v1274_v8 = vpop.xlane.xlu1 %1273  ;;  %v1276_v21 = vpop.xlane.xlu0 %1275  ;;  %v1291_v7 = vmul.f32 3.0, %v1259_v44  ;;  %v1112_v9 = vmul.f32 3.0, %v1080_v28 }
 0x1cc   : > { %v1164_v23 = vsel %vm976_vm3, %v1145_v37, %v1163_v48  ;;  %v1296_v32 = vsub.f32 %v1288_v19, %v1274_v8  ;;  %v1297_v40 = vsub.f32 %v1289_v58, %v1276_v21  ;;  %v2887_v48 = vld [vmem:[#allocation7_spill] sm:$0xff]  ;;  %v1081_v37 = vadd.f32 %v1073_v4, %v2889_v55  ;;  %v1989_v8 = vpop.eup %1988  ;;  %v2892_v55 = vld [vmem:[#allocation16_spill] sm:$0xff] }
 0x1cd   : > { %v890_v18 = vadd.f32 %v881_v62, %v2887_v48  ;;  %v883_v19 = vmul.f32 0.6931472, %v1987_v52  ;;  %v921_v58 = vmul.f32 3.0, %v889_v50  ;;  %v928_v21 = vsub.f32 %v920_v10, %v2620_v56  ;;  %v605_v10 = vld [vmem:[%s2646_s15 + $0x8] sm:$0xff] }
 0x1ce   : > { %v1318_v1 = vrot.slane %v1296_v32, %v2593_v24  ;;  %v1322_v12 = vrot.slane %v1297_v40, %v2593_v24  ;;  %vm627_vm8 = vcmp.lt.s32.totalorder %v2416_v3, %v2892_v55 }
 0x1cf   : > { %v1099_v59 = vpop.xlane.xlu1 %1098  ;;  %v1101_v35 = vpop.xlane.xlu0 %1100  ;;  %v922_v51 = vmul.f32 3.0, %v890_v18  ;;  %v959_v62 = vrot.slane %v928_v21, %v2593_v24 }
 0x1d0   : > { %v1343_v47 = vsel %vm972_vm1, %v1318_v1, %v1314_v5  ;;  %v1118_v16 = vsub.f32 %v1110_v36, %v1099_v59  ;;  %v1119_v32 = vsub.f32 %v1111_v20, %v1101_v35  ;;  %v1113_v5 = vmul.f32 3.0, %v1081_v37  ;;  %v1991_v1 = vpop.eup %1990  ;;  %v604_v35 = vld [vmem:[%s2646_s15] sm:$0xff] }
 0x1d1   : > { %v1344_v15 = vsel %vm974_vm2, %v1322_v12, %v1343_v47  ;;  %v1250_v12 = vmul.f32 0.6931472, %v1989_v8  ;;  %v891_v59 = vadd.f32 %v883_v19, %v2890_v43  ;;  %v1252_v45 = vmul.f32 0.6931472, %v1991_v1 }
 0x1d2   : > { %v1149_v17 = vrot.slane %v1118_v16, %v2593_v24  ;;  %v1153_v53 = vrot.slane %v1119_v32, %v2593_v24  ;;  %v1491_v44 = vsub.f32 %v604_v35, %v2531_v30  ;;  %v979_v20 = vsel %vm978_vm4, %v959_v62, %v2615_v42 }
 0x1d3   : > { %v911_v61 = vpop.xlane.xlu1 %910  ;;  %v913_v38 = vpop.xlane.xlu0 %912  ;;  %v923_v16 = vmul.f32 3.0, %v891_v59  ;;  %v1492_v19 = vsub.f32 %v605_v10, %v2533_v31 }
 0x1d4   : > { %v929_v26 = vsub.f32 %v921_v58, %v911_v61  ;;  %v1165_v47 = vsel %vm978_vm4, %v1149_v17, %v1164_v23  ;;  %v930_v63 = vsub.f32 %v922_v51, %v913_v38  ;;  %v2891_v61 = vld [vmem:[#allocation17_spill] sm:$0xff]  ;;  %v1499_v37 = vand.u32 2147483647, %v1491_v44 }
 0x1d5   : > { %v1260_v38 = vadd.f32 %v1250_v12, %v2891_v61 }
 0x1d6   : > { %v963_v36 = vrot.slane %v929_v26, %v2593_v24  ;;  %v967_v48 = vrot.slane %v930_v63, %v2593_v24  ;;  %v611_v26 = vld [vmem:[%s2646_s15 + $0x38] sm:$0xff] }
 0x1d7   : > { %v1278_v40 = vpop.xlane.xlu1 %1277  ;;  %v1280_v60 = vpop.xlane.xlu0 %1279  ;;  %v1498_v35 = vsub.f32 %v611_v26, %v2552_v0 }
 0x1d8   : > { %v1298_v34 = vsub.f32 %v1290_v29, %v1278_v40  ;;  %v1299_v13 = vsub.f32 %v1291_v7, %v1280_v60  ;;  %v981_v30 = vsel %vm980_vm5, %v963_v36, %v979_v20  ;;  %v1292_v29 = vmul.f32 3.0, %v1260_v38  ;;  %v2893_v7 = vld [vmem:[#allocation10_spill] sm:$0xff]  ;;  %v608_v36 = vld [vmem:[%s2646_s15 + $0x20] sm:$0xff] }
 0x1d9   : > { %v1261_v8 = vadd.f32 %v1252_v45, %v2893_v7  ;;  %v983_v40 = vsel %vm982_vm7, %v967_v48, %v981_v30  ;;  %v1495_v44 = vsub.f32 %v608_v36, %v2538_v25  ;;  %v2723_v20 = vld [vmem:[%s601_s23] sm:$0xff] }
 0x1da   : > { %v1326_v14 = vrot.slane %v1298_v34, %v2593_v24  ;;  %v1330_v56 = vrot.slane %v1299_v13, %v2593_v24  ;;  %v606_v34 = vld [vmem:[%s2646_s15 + $0x10] sm:$0xff] }
 0x1db   : > { %v1103_v4 = vpop.xlane.xlu1 %1102  ;;  %v1105_v22 = vpop.xlane.xlu0 %1104  ;;  %v1293_v12 = vmul.f32 3.0, %v1261_v8  ;;  %v1493_v62 = vsub.f32 %v606_v34, %v2546_v49  ;;  %v1506_v49 = vand.u32 2147483647, %v1498_v35  ;;  %v1503_v25 = vand.u32 2147483647, %v1495_v44 }
 0x1dc   : > { %v1345_v54 = vsel %vm976_vm3, %v1326_v14, %v1344_v15  ;;  %v1120_v50 = vsub.f32 %v1112_v9, %v1103_v4  ;;  %v1121_v11 = vsub.f32 %v1113_v5, %v1105_v22  ;;  %v1166_v15 = vsel %vm980_vm5, %v1153_v53, %v1165_v47 }
 0x1dd   : > { %v1346_v39 = vsel %vm978_vm4, %v1330_v56, %v1345_v54  ;;  %v1500_v9 = vand.u32 2147483647, %v1492_v19  ;;  %v607_v56 = vld [vmem:[%s2646_s15 + $0x18] sm:$0xff] }
 0x1de   : > { %v1157_v23 = vrot.slane %v1120_v50, %v2593_v24  ;;  %v1161_v52 = vrot.slane %v1121_v11, %v2593_v24  ;;  %v1494_v22 = vsub.f32 %v607_v56, %v2548_v27  ;;  %v1501_v11 = vand.u32 2147483647, %v1493_v62 }
 0x1df   : > { %v915_v18 = vpop.xlane.xlu1 %914 }
 0x1e0   : > { %v931_v2 = vsub.f32 %v923_v16, %v915_v18  ;;  %v1167_v28 = vsel %vm982_vm7, %v1157_v23, %v1166_v15  ;;  %v609_v16 = vld [vmem:[%s2646_s15 + $0x28] sm:$0xff] }
 0x1e1   : > { %v1168_v42 = vsel %vm984_vm6, %v1161_v52, %v1167_v28  ;;  %v1502_v52 = vand.u32 2147483647, %v1494_v22  ;;  %v1496_v15 = vsub.f32 %v609_v16, %v2540_v33  ;;  %v610_v28 = vld [vmem:[%s2646_s15 + $0x30] sm:$0xff] }
 0x1e2   : > { %v971_v58 = vrot.slane %v931_v2, %v2593_v24  ;;  %v2680_v21 = vsel %vm627_vm8, %v1168_v42, 0.0  ;;  %v1497_v42 = vsub.f32 %v610_v28, %v2550_v57 }
 0x1e3   : > { %v1282_v17 = vpop.xlane.xlu1 %1281  ;;  %v2682_v32 = vpop.permute.xlu0 %1878  ;;  %v1504_v19 = vand.u32 2147483647, %v1496_v15 }
 0x1e4   : > { %v1300_v60 = vsub.f32 %v1292_v29, %v1282_v17  ;;  %v1880_v31 = vunpack.i.l.bf16 %v2682_v32  ;;  %v985_v13 = vsel %vm984_vm6, %v971_v58, %v983_v40  ;;  %v1881_v51 = vunpack.i.h.bf16 %v2682_v32 }
 0x1e5   : > { %v987_v5 = vsel %vm627_vm8, %v985_v13, 0.0  ;;  %v1505_v17 = vand.u32 2147483647, %v1497_v42 }
 0x1e6   : > { %v1334_v1 = vrot.slane %v1300_v60, %v2593_v24  ;;  %v1515_v14 = vmul.f32 %v1880_v31, %v1499_v37  ;;  %v1516_v4 = vmul.f32 %v1881_v51, %v1500_v9  ;;  %v1478_v37 = vand.u32 2147483647, %v2723_v20 }
 0x1e7   : > { %v1284_v43 = vpop.xlane.xlu1 %1283  ;;  %v2697_v59 = vpop.permute.xlu0 %1889  ;;  %v989_v33 = vsel %vm988_vm10, %v987_v5, 0.0  ;;  %v1171_v60 = vsel %vm988_vm10, %v2680_v21, 0.0  ;;  %v1443_v5 = vrot.slane %v1881_v51, %v2593_v24  ;;  %v1439_v21 = vrot.slane %v1880_v31, %v2593_v24 }
 0x1e8   : > { %v1347_v47 = vsel %vm980_vm5, %v1334_v1, %v1346_v39  ;;  %v1301_v53 = vsub.f32 %v1293_v12, %v1284_v43  ;;  %v1524_v63 = vsel %vm1523_vm9, %v1515_v14, 0.0  ;;  %v1527_v23 = vsel %vm1523_vm9, %v1516_v4, 0.0 }
 0x1e9   : > { %1525 = vadd.xlane.f32.xlu1 %v1524_v63  ;;  %v1891_v48 = vunpack.i.l.bf16 %v2697_v59  ;;  %v1892_v58 = vunpack.i.h.bf16 %v2697_v59  ;;  %v1479_v8 = vsub.f32 0.0, %v1478_v37  ;;  %v1468_v14 = vsel %vm972_vm1, %v1443_v5, %v1439_v21  ;;  %v588_v63 = vld [vmem:[%s587_s25] sm:$0xff] }
 0x1ea   : > { %v1338_v54 = vrot.slane %v1301_v53, %v2593_v24 }
 0x1eb   : > { %v1885_v50 = vpop.permute.xlu1 %1884  ;;  %v2708_v0 = vpop.permute.xlu0 %1894  ;;  %v1519_v7 = vmul.f32 %v1891_v48, %v1503_v25  ;;  %v1520_v34 = vmul.f32 %v1892_v58, %v1504_v19  ;;  %v1480_v57 = vmul.f32 1.442695, %v1479_v8  ;;  %v1455_v35 = vrot.slane %v1891_v48, %v2593_v24 }
 0x1ec   : > { %v1886_v45 = vunpack.i.l.bf16 %v1885_v50  ;;  %v1897_v39 = vunpack.i.h.bf16 %v2708_v0  ;;  %v1887_v27 = vunpack.i.h.bf16 %v1885_v50  ;;  %v2719_v61 = vsel %vm982_vm7, %v1338_v54, %v1347_v47  ;;  %v2894_v50 = vld [vmem:[#allocation18_spill] sm:$0xff] }
 0x1ed   : > { %1528 = vadd.xlane.f32.xlu1 %v1527_v23  ;;  %v1896_v40 = vunpack.i.l.bf16 %v2708_v0  ;;  %v1536_v26 = vsel %vm1523_vm9, %v1519_v7, 0.0  ;;  %v1539_v13 = vsel %vm1523_vm9, %v1520_v34, 0.0  ;;  %1992 = vpow2.f32 %v1480_v57 }
 0x1ee   : > { %v1522_v38 = vmul.f32 %v1897_v39, %v1506_v49  ;;  %v1517_v10 = vmul.f32 %v1886_v45, %v1501_v11  ;;  %v1518_v2 = vmul.f32 %v1887_v27, %v1502_v52  ;;  %v1447_v12 = vrot.slane %v1886_v45, %v2593_v24 }
 0x1ef   : > { %v1521_v9 = vmul.f32 %v1896_v40, %v1505_v17  ;;  %v1451_v56 = vrot.slane %v1887_v27, %v2593_v24  ;;  %1994 = vlog2.f32 %v2589_v6  ;;  %v1459_v62 = vrot.slane %v1892_v58, %v2593_v24 }
 0x1f0   : > { %v1545_v18 = vsel %vm1523_vm9, %v1522_v38, 0.0  ;;  %v1530_v30 = vsel %vm1523_vm9, %v1517_v10, 0.0  ;;  %v1533_v29 = vsel %vm1523_vm9, %v1518_v2, 0.0  ;;  %v1469_v43 = vsel %vm974_vm2, %v1447_v12, %v1468_v14 }
 0x1f1   : > { %1546 = vadd.xlane.f32.xlu0 %v1545_v18  ;;  %1531 = vadd.xlane.f32.xlu1 %v1530_v30  ;;  %v1542_v1 = vsel %vm1523_vm9, %v1521_v9, 0.0  ;;  %v1470_v51 = vsel %vm976_vm3, %v1451_v56, %v1469_v43  ;;  %v1463_v53 = vrot.slane %v1896_v40, %v2593_v24  ;;  %v1467_v36 = vrot.slane %v1897_v39, %v2593_v24 }
 0x1f2   : > { %v1471_v31 = vsel %vm978_vm4, %v1455_v35, %v1470_v51  ;;  %v1403_v45 = vmax.f32 %v2723_v20, 0.0 }
 0x1f3   : > { %v1472_v47 = vsel %vm980_vm5, %v1459_v62, %v1471_v31  ;;  %v2006_v31 = vld [vmem:[%s2283_s29] sm:$0xff] }
 0x1f4   : > { %v1473_v4 = vsel %vm982_vm7, %v1463_v53, %v1472_v47  ;;  %v585_v62 = vcvt.s32.f32 %v2006_v31 }
 0x1f5   : > { %990 = vadd.xlane.f32.xlu0 %v989_v33  ;;  %1534 = vadd.xlane.f32.xlu1 %v1533_v29  ;;  %v1474_v54 = vsel %vm984_vm6, %v1467_v36, %v1473_v4 }
 0x1f6   : > { %v1476_v44 = vmul.f32 %v1474_v54, %v2723_v20  ;;  %v1599_v37 = vsel %vm988_vm10, %v1474_v54, 0.0 }
 0x1f7   : > { %v1993_v59 = vpop.eup %1992 }
 0x1f8   : > { %v1482_v32 = vadd.f32 1.0, %v1993_v59  ;;  %v1477_v0 = vsub.f32 %v1403_v45, %v1476_v44  ;;  %v2895_v45 = vmov 0  }
 0x1f9   : > { %1172 = vadd.xlane.f32.xlu0 %v1171_v60  ;;  %1537 = vadd.xlane.f32.xlu1 %v1536_v26  ;;  %v1995_v6 = vpop.eup %1994 }
 0x1fa   : > { %1996 = vlog2.f32 %v1482_v32  ;;  %v1254_v22 = vmul.f32 0.6931472, %v1995_v6  ;;  %v586_v6 = vmax.f32 %v585_v62, 1.0 }
 0x1fc   : > { %v1262_v49 = vadd.f32 %v1254_v22, %v2894_v50  ;;  %v590_v50 = vld [vmem:[%s589_s30] sm:$0xff] }
 0x1fd   : > { %1540 = vadd.xlane.f32.xlu1 %v1539_v13  ;;  %vm621_vm12 = vcmp.gt.f32.partialorder %v590_v50, 0.0 }
 0x1fe   : > { %v1294_v52 = vmul.f32 3.0, %v1262_v49  ;;  %v1649_v44 = vsel %vm621_vm12, 1, %v2895_v45 }
 0x201   : > { %1543 = vadd.xlane.f32.xlu1 %v1542_v1 }
 0x204   : > { %v1997_v27 = vpop.eup %1996 }
 0x205   : > { %v1484_v39 = vmul.f32 0.6931472, %v1997_v27 }
 0x207   : > { %v1485_v15 = vadd.f32 %v1484_v39, %v1477_v0 }
 0x209   : > { %v1486_v30 = vsel %vm627_vm8, %v1485_v15, 0.0 }
 0x20a   : > { %v1487_v2 = vsel %vm988_vm10, %v1486_v30, 0.0 }
 0x212   : > { %1368 = vperm.xlu1 %1882, %v588_v63  }
 0x218   : > { %v2768_v11 = vpop.xlane.xlu0 %1357 }
 0x219   : > { %v1359_v23 = vsub.f32 %v2565_v41, %v2768_v11 }
 0x21b   : > { %v1360_v16 = vmul.f32 1.442695, %v1359_v23 }
 0x21c   : > { %v1286_v38 = vpop.xlane.xlu1 %1285 }
 0x21d   : > { %v1302_v10 = vsub.f32 %v1294_v52, %v1286_v38  ;;  %1998 = vpow2.f32 %v1360_v16 }
 0x21e   : > { %2000 = vrcp.f32 %v586_v6 }
 0x21f   : > { %v1342_v25 = vrot.slane %v1302_v10, %v2593_v24 }
 0x221   : > { %v1349_v48 = vsel %vm984_vm6, %v1342_v25, %v2719_v61 }
 0x222   : > { %v1351_v20 = vsel %vm627_vm8, %v1349_v48, 0.0 }
 0x223   : > { %v1352_v18 = vsel %vm988_vm10, %v1351_v20, 0.0 }
 0x224   : > { %1353 = vadd.xlane.f32.xlu0 %v1352_v18 }
 0x227   : > { %v1999_v28 = vpop.eup %1998 }
 0x228   : > { %1488 = vadd.xlane.f32.xlu0 %v1487_v2  ;;  %v2001_v4 = vpop.eup %2000 }
 0x22c   : > { %1362 = vadd.xlane.f32.xlu0 %v1999_v28 }
 0x236   : > { %1600 = vadd.xlane.f32.xlu1 %v1599_v37 }
 0x276   : > { %v1526_v61 = vpop.xlane.xlu1 %1525 }
 0x277   : > { %v1559_v17 = vrot.slane %v1526_v61, %v2593_v24 }
 0x27a   : > { %v1529_v19 = vpop.xlane.xlu1 %1528 }
 0x27b   : > { %v1563_v8 = vrot.slane %v1529_v19, %v2593_v24 }
 0x27d   : > { %v1588_v34 = vsel %vm972_vm1, %v1563_v8, %v1559_v17  ;;  %vm1632_vm1 = vcmp.eq.s32.totalorder %v2416_v3, 3 }
 0x27e   : > { %v1532_v42 = vpop.xlane.xlu1 %1531  ;;  %v1547_v12 = vpop.xlane.xlu0 %1546 }
 0x27f   : > { %v1567_v55 = vrot.slane %v1532_v42, %v2593_v24  ;;  %v1587_v51 = vrot.slane %v1547_v12, %v2593_v24 }
 0x281   : > { %v1589_v13 = vsel %vm974_vm2, %v1567_v55, %v1588_v34  ;;  %vm1635_vm2 = vcmp.eq.s32.totalorder %v2416_v3, 4 }
 0x282   : > { %v1535_v58 = vpop.xlane.xlu1 %1534  ;;  %v991_v53 = vpop.xlane.xlu0 %990 }
 0x283   : > { %v1571_v40 = vrot.slane %v1535_v58, %v2593_v24  ;;  %v993_v54 = vmul.f32 %v2001_v4, %v991_v53 }
 0x285   : > { %v1590_v21 = vsel %vm976_vm3, %v1571_v40, %v1589_v13  ;;  %vm1643_vm3 = vcmp.eq.s32.totalorder %v2416_v3, 5 }
 0x286   : > { %v1538_v33 = vpop.xlane.xlu1 %1537  ;;  %v1173_v63 = vpop.xlane.xlu0 %1172 }
 0x287   : > { %v1575_v60 = vrot.slane %v1538_v33, %v2593_v24 }
 0x289   : > { %v1591_v14 = vsel %vm978_vm4, %v1575_v60, %v1590_v21  ;;  %vm1646_vm4 = vcmp.eq.s32.totalorder %v2416_v3, 6 }
 0x28a   : > { %v1541_v29 = vpop.xlane.xlu1 %1540 }
 0x28b   : > { %v1579_v57 = vrot.slane %v1541_v29, %v2593_v24 }
 0x28d   : > { %v1592_v56 = vsel %vm980_vm5, %v1579_v57, %v1591_v14 }
 0x28e   : > { %v1544_v7 = vpop.xlane.xlu1 %1543 }
 0x28f   : > { %v1583_v9 = vrot.slane %v1544_v7, %v2593_v24 }
 0x291   : > { %v1593_v59 = vsel %vm982_vm7, %v1583_v9, %v1592_v56 }
 0x292   : > { %v1369_v26 = vpop.permute.xlu1 %1368  ;;  %v1594_v32 = vsel %vm984_vm6, %v1587_v51, %v1593_v59  ;;  %vm1664_vm6 = vcmask 57344  }
 0x293   : > { %vm1370_vm11 = vcmp.eq.s32.totalorder %v2416_v3, %v1369_v26  ;;  %v1596_v47 = vsel %vm988_vm10, %v1594_v32, 0.0 }
 0x294   : > { %v1827_v5 = vsel %vm1370_vm11, 1.0, %v2035_v46 }
 0x295   : > { %v1373_v1 = vmul.f32 0.7, %v1827_v5 }
 0x297   : > { %v1374_v43 = vadd.f32 0.00234375, %v1373_v1  ;;  %v1655_v1 = vld [vmem:[#allocation2] sm:$0x1] }
 0x299   : > { %v1375_v35 = vmul.f32 %v1374_v43, %v2565_v41  ;;  %v1174_v41 = vmul.f32 %v2001_v4, %v1173_v63 }
 0x29b   : > { %1376 = vadd.xlane.f32.xlu0 %v1375_v35 }
 0x29f   : > { %1597 = vadd.xlane.f32.xlu0 %v1596_v47 }
 0x2b1   : > { %v1354_v22 = vpop.xlane.xlu0 %1353 }
 0x2b2   : > { %v1355_v36 = vmul.f32 %v2001_v4, %v1354_v22 }
 0x2b4   : > { %1627 = vperm.xlu1 %1882, %v1355_v36  }
 0x2b5   : > { %1612 = vperm.xlu0 %1876, %v993_v54   ;;  %v1489_v24 = vpop.xlane.xlu0 %1488 }
 0x2b6   : > { %v1490_v49 = vmul.f32 %v2001_v4, %v1489_v24 }
 0x2b9   : > { %1619 = vperm.xlu0 %1876, %v1174_v41   ;;  %v1363_v27 = vpop.xlane.xlu0 %1362 }
 0x2ba   : > { %2002 = vlog2.f32 %v1363_v27 }
 0x2bd   : > { %1638 = vperm.xlu0 %1876, %v1490_v49  }
 0x2c1   : > { %1651 = vperm.xlu0 %1876, %v1649_v44  }
 0x2c3   : > { %v1601_v52 = vpop.xlane.xlu1 %1600 }
 0x2c4   : > { %v1606_v16 = vmax.f32 %v1601_v52, 1.0  ;;  %v2003_v38 = vpop.eup %2002  ;;  %vm1602_vm13 = vcmp.gt.f32.partialorder %v1601_v52, 0.0 }
 0x2c5   : > { %v1365_v39 = vmul.f32 0.6931472, %v2003_v38  ;;  %v1836_v15 = vsel %vm1602_vm13, 1.0, %v2035_v46 }
 0x2c6   : > { %2004 = vrcp.f32 %v1606_v16  ;;  %v1647_v40 = vsel %vm1646_vm4, %v1836_v15, 0.0 }
 0x2c7   : > { %v1366_v25 = vadd.f32 %v1365_v39, %v2768_v11 }
 0x2d0   : > { %v2005_v19 = vpop.eup %2004 }
 0x328   : > { %v1377_v23 = vpop.xlane.xlu0 %1376 }
 0x329   : > { %v1378_v18 = vsub.f32 %v1366_v25, %v1377_v23 }
 0x32b   : > { %v1633_v11 = vsel %vm1632_vm1, %v1378_v18, 0.0 }
 0x32c   : > { %v1598_v0 = vpop.xlane.xlu0 %1597 }
 0x32d   : > { %v1605_v30 = vmul.f32 %v1836_v15, %v1598_v0 }
 0x32f   : > { %v1608_v33 = vmul.f32 %v2005_v19, %v1605_v30 }
 0x331   : > { %v1644_v8 = vsel %vm1643_vm3, %v1608_v33, 0.0 }
 0x333   : > { %v1628_v48 = vpop.permute.xlu1 %1627 }
 0x334   : > { %v1613_v10 = vpop.permute.xlu0 %1612  ;;  %v1630_v61 = vsel %vm1624_vm0, %v1628_v48, 0.0 }
 0x335   : > { %v1615_v2 = vsel %vm1609_vm14, %v1613_v10, 0.0 }
 0x338   : > { %v1620_v20 = vpop.permute.xlu0 %1619 }
 0x339   : > { %v1622_v28 = vsel %vm1616_vm15, %v1620_v20, 0.0 }
 0x33a   : > { %v1623_v37 = vadd.f32 %v1622_v28, %v1615_v2 }
 0x33c   : > { %v1631_v42 = vadd.f32 %v1630_v61, %v1623_v37  ;;  %v1639_v58 = vpop.permute.xlu0 %1638 }
 0x33d   : > { %v1641_v29 = vsel %vm1635_vm2, %v1639_v58, 0.0 }
 0x33e   : > { %v1634_v46 = vadd.f32 %v1633_v11, %v1631_v42 }
 0x340   : > { %v1642_v7 = vadd.f32 %v1641_v29, %v1634_v46  ;;  %v1652_v17 = vpop.permute.xlu0 %1651 }
 0x341   : > { %vm1653_vm5 = vcmp.eq.s32.totalorder %v1652_v17, 1 }
 0x342   : > { %v1645_v55 = vadd.f32 %v1644_v8, %v1642_v7 }
 0x344   : > { %v1648_v60 = vadd.f32 %v1647_v40, %v1645_v55 }
 0x346   : > { %v1654_v26 = vsel %vm1653_vm5, %v1648_v60, 0.0 }
 0x347   : > { %v1656_v34 = vsel %vm988_vm10, %v1654_v26, 0.0 }
 0x348   : > { %v1657_v57 = vrot.slane %v1656_v34, 4 }
 0x34a   : > { %v1658_v13 = vadd.f32 %v1657_v57, %v1656_v34 }
 0x34c   : > { %v1659_v9 = vrot.slane %v1658_v13, 2 }
 0x34e   : > { %v1660_v5 = vadd.f32 %v1659_v9, %v1658_v13 }
 0x350   : > { %v1661_v21 = vrot.slane %v1660_v5, 1  ;;  %1669 = sbr.rel (%p1837_p7) target bundleno = 863 (0x35f), region = 72 }
 0x352   : > { %v1662_v12 = vadd.f32 %v1661_v21, %v1660_v5 }
 0x354   : > { %v1663_v14 = vadd.f32 %v1662_v12, %v1655_v1 }
 0x356   : > { %1665 = vst.msk [vmem:[#allocation2] sm:$0x1] %vm1664_vm6, %v1663_v14 }
 0x35d   : > { %v1670_v3 = vld [vmem:[#allocation2] sm:$0x1] }
 0x35e   : > { %1671 = vst.msk [vmem:[%s2845_s11] sm:$0x1] %vm1664_vm6, %v1670_v3 }
 0x35f PF: > { %s21_s19 = sadd.s32 1, %s2029_s19   ;;  %s2896_s12 = sld [smem:[#allocation3_spill]] }
 0x360   : > { %p18_p8 = scmp.ge.s32.totalorder %s21_s19, 5   ;;  %s2897_s17 = smov %s2025_s18 }
 0x362   :  { %20 = sbr.rel (!%p18_p8) target bundleno = 2 (0x2), region = 118 }
 0x365   : > { %s2898_s18 = smov %s2896_s12 }

</bundles_post_ra>
